<compile_context>
chip_gen: v5e
topology: v5e:2x2
jax: 0.10.0
libtpu: 0.0.40
codegen_flags: <defaults>
</compile_context>

<pallas_src>
import functools

import jax
import jax.numpy as jnp
from jax.experimental import pallas as pl
from jax.experimental.pallas import tpu as pltpu


def _round_up(x, m):
    return (x + m - 1) // m * m


# ----------------------------- Pallas kernels ------------------------------

def conv_relu_gap_kernel(x_ref, w_ref, b_ref, mask_ref, feat_ref, pool_ref,
                         *, wp):
    # x_ref:    (1, (H+2)*Wp + 2, C_in) f32  -- flat zero-padded image rows
    # w_ref:    (9, C_in, CF_PAD)       bf16 -- per-tap conv weights (padded N)
    # b_ref:    (1, CF_PAD)             f32
    # mask_ref: (H*Wp, 1)               f32  -- 1/(H*W) on real cols, else 0
    # feat_ref: (1, H*Wp, CF_PAD)       f32  -- ReLU features (+2 junk cols)
    # pool_ref: (1, 1, CF_PAD)          f32  -- fused global average pool
    nrows = feat_ref.shape[1]
    cfp = feat_ref.shape[2]
    x = x_ref[0]                                       # (NP, C_in) f32
    acc = jnp.zeros((nrows, cfp), jnp.float32)
    # 3x3 conv == 9 statically-shifted matmuls accumulated in f32 (in-kernel
    # im2col; row-major flattening makes every tap a contiguous row slice).
    for t in range(9):
        kh, kw = divmod(t, 3)
        off = kh * wp + kw                             # static shift per tap
        xs = x[off:off + nrows, :].astype(jnp.bfloat16)
        acc = acc + jnp.dot(xs, w_ref[t], preferred_element_type=jnp.float32)
    acc = jnp.maximum(acc + b_ref[...], 0.0)           # bias + ReLU (f32)
    feat_ref[0] = acc                                  # lane-dense store
    # fused GAP: masked row sum (mask already carries the 1/(H*W) factor)
    pool_ref[0] = jnp.sum(acc * mask_ref[...], axis=0, keepdims=True)


def head_cosine_kernel(p1_ref, p2_ref, wh_ref, bh_ref, score_ref):
    # p*_ref: (B, CF_PAD), wh_ref: (CF_PAD, D_PAD), bh_ref: (1, D_PAD)
    # score_ref: (B, 1)
    z1 = jnp.dot(p1_ref[...], wh_ref[...],
                 preferred_element_type=jnp.float32) + bh_ref[...]
    z2 = jnp.dot(p2_ref[...], wh_ref[...],
                 preferred_element_type=jnp.float32) + bh_ref[...]
    eps = jnp.float32(1e-8)
    n1 = jnp.sqrt(jnp.sum(z1 * z1, axis=-1, keepdims=True))
    n2 = jnp.sqrt(jnp.sum(z2 * z2, axis=-1, keepdims=True))
    dot = jnp.sum(z1 * z2, axis=-1, keepdims=True)
    # torch.nn.CosineSimilarity: x1.x2 / (max(||x1||,eps) * max(||x2||,eps))
    denom = jnp.maximum(n1, eps) * jnp.maximum(n2, eps)
    score_ref[...] = dot * pl.reciprocal(denom, approx=True)


# ------------------------------ glue (JAX) ---------------------------------

def _flatten_padded(img):
    # img: (B, C, H, W) NCHW -> (B, (H+2)*(W+2) + 2, C): row-major flatten of
    # the zero-padded NHWC image, plus 2 trailing zero rows so every 3x3 tap
    # is a contiguous, in-bounds row slice inside the kernel.
    B, C, H, W = img.shape
    x = jnp.transpose(img, (0, 2, 3, 1))                      # NHWC
    x = jnp.pad(x, ((0, 0), (1, 1), (1, 1), (0, 0)))          # (B, H+2, W+2, C)
    x = x.reshape(B, (H + 2) * (W + 2), C)
    return jnp.pad(x, ((0, 0), (0, 2), (0, 0)))


def gradcam_forward(img1, img2, w_conv, b_conv, w_head, b_head):
    """Returns (score, features1, features2); score shape (B,) like GradCAM."""
    B, C_in, H, W = img1.shape
    C_feat = w_conv.shape[0]
    D = w_head.shape[0]
    Wp = W + 2
    nrows = H * Wp                                    # extended spatial rows
    NP = (H + 2) * Wp + 2
    CF_PAD = _round_up(C_feat, 128)
    D_PAD = _round_up(D, 128)

    # ---- operand prep (tiny, once, plain JAX) ------------------------------
    x_all = jnp.concatenate([_flatten_padded(img1), _flatten_padded(img2)],
                            axis=0).astype(jnp.float32)       # (2B, NP, C_in)

    # per-tap weights (kh, kw major, C_in inner), channel-padded to 128
    w_taps = jnp.transpose(w_conv, (2, 3, 1, 0)).reshape(9, C_in, C_feat)
    w_taps = jnp.pad(w_taps, ((0, 0), (0, 0), (0, CF_PAD - C_feat)))
    w_taps = w_taps.astype(jnp.bfloat16)
    b_row = jnp.pad(b_conv, (0, CF_PAD - C_feat)).reshape(1, CF_PAD)
    b_row = b_row.astype(jnp.float32)

    # pooling mask: 1/(H*W) on real columns (w' < W), 0 on the 2 junk columns
    col = jnp.arange(nrows, dtype=jnp.int32) % Wp
    mask = jnp.where(col < W, 1.0 / (H * W), 0.0).astype(jnp.float32)
    mask = mask.reshape(nrows, 1)

    kernel = functools.partial(conv_relu_gap_kernel, wp=Wp)
    cost = pl.CostEstimate(
        flops=2 * (2 * B) * nrows * (9 * C_in) * CF_PAD,
        transcendentals=0,
        bytes_accessed=(x_all.size * 4 + w_taps.size * 2 + b_row.size * 4 +
                        mask.size * 4 + (2 * B) * nrows * CF_PAD * 4 +
                        (2 * B) * CF_PAD * 4))

    feats_ext, pooled = pl.pallas_call(
        kernel,
        grid=(2 * B,),
        in_specs=[
            pl.BlockSpec((1, NP, C_in), lambda g: (g, 0, 0)),      # per-image
            pl.BlockSpec((9, C_in, CF_PAD), lambda g: (0, 0, 0)),  # resident
            pl.BlockSpec((1, CF_PAD), lambda g: (0, 0)),
            pl.BlockSpec((nrows, 1), lambda g: (0, 0)),
        ],
        out_specs=(
            pl.BlockSpec((1, nrows, CF_PAD), lambda g: (g, 0, 0)),
            pl.BlockSpec((1, 1, CF_PAD), lambda g: (g, 0, 0)),
        ),
        out_shape=(
            jax.ShapeDtypeStruct((2 * B, nrows, CF_PAD), jnp.float32),
            jax.ShapeDtypeStruct((2 * B, 1, CF_PAD), jnp.float32),
        ),
        compiler_params=pltpu.CompilerParams(
            dimension_semantics=("parallel",),
            vmem_limit_bytes=32 * 1024 * 1024),
        cost_estimate=cost,
    )(x_all, w_taps, b_row, mask)

    # ---- tiny head + cosine kernel on the fused-pooled features ------------
    pooled = pooled.reshape(2, B, CF_PAD)
    wh = jnp.pad(w_head.T, ((0, CF_PAD - C_feat), (0, D_PAD - D)))
    wh = wh.astype(jnp.float32)
    bh = jnp.pad(b_head, (0, D_PAD - D)).reshape(1, D_PAD).astype(jnp.float32)

    vmem = pl.BlockSpec(memory_space=pltpu.MemorySpace.VMEM)
    score = pl.pallas_call(
        head_cosine_kernel,
        out_shape=jax.ShapeDtypeStruct((B, 1), jnp.float32),
        in_specs=[vmem, vmem, vmem, vmem],
        out_specs=vmem,
    )(pooled[0], pooled[1], wh, bh)
    score = score.reshape(B)

    # features (what GradCAM's save_features keeps), unpadded, back in NCHW
    feats = feats_ext.reshape(2, B, H, Wp, CF_PAD)[:, :, :, :W, :C_feat]
    feats = jnp.transpose(feats, (0, 1, 4, 2, 3))     # (2, B, C_feat, H, W)
    return score, feats[0], feats[1]


# ------------------------------- main --------------------------------------

if __name__ == "__main__":
    key = jax.random.PRNGKey(0)
    k1, k2, k3, k4, k5, k6 = jax.random.split(key, 6)

    B, C_in, H, W = 2, 4, 16, 16
    C_feat, D_proj = 32, 32

    img1 = jax.random.normal(k1, (B, C_in, H, W), jnp.float32)
    img2 = jax.random.normal(k2, (B, C_in, H, W), jnp.float32)

    # deterministic synthetic parameters (PyTorch layouts: conv (Co,Ci,KH,KW),
    # linear (out,in))
    w_conv = 0.1 * jax.random.normal(k3, (C_feat, C_in, 3, 3), jnp.float32)
    b_conv = 0.1 * jax.random.normal(k4, (C_feat,), jnp.float32)
    w_head = 0.1 * jax.random.normal(k5, (D_proj, C_feat), jnp.float32)
    b_head = 0.1 * jax.random.normal(k6, (D_proj,), jnp.float32)

    score, f1, f2 = gradcam_forward(img1, img2, w_conv, b_conv, w_head, b_head)
    jax.block_until_ready(score)
    assert score.shape == (B,)
    assert f1.shape == (B, C_feat, H, W) and f2.shape == (B, C_feat, H, W)

    # pure-JAX f32 reference of the same forward pass (loose tol: bf16 MXU)
    def ref_features(x):
        y = jax.lax.conv_general_dilated(
            x, w_conv, window_strides=(1, 1), padding="SAME",
            dimension_numbers=("NCHW", "OIHW", "NCHW"))
        return jnp.maximum(y + b_conv[None, :, None, None], 0.0)

    rf1, rf2 = ref_features(img1), ref_features(img2)
    o1 = rf1.mean(axis=(2, 3)) @ w_head.T + b_head
    o2 = rf2.mean(axis=(2, 3)) @ w_head.T + b_head
    n1 = jnp.sqrt(jnp.sum(o1 * o1, -1))
    n2 = jnp.sqrt(jnp.sum(o2 * o2, -1))
    ref_score = jnp.sum(o1 * o2, -1) / (jnp.maximum(n1, 1e-8) *
                                        jnp.maximum(n2, 1e-8))

    assert jnp.allclose(score, ref_score, atol=5e-2, rtol=5e-2)
    assert jnp.allclose(f1, rf1, atol=5e-2, rtol=5e-2)
    assert jnp.allclose(f2, rf2, atol=5e-2, rtol=5e-2)
    print("KERNEL_OK")
</pallas_src>

<mosaic_0001>
module attributes {stable_mosaic.version = 11 : i64} {
  func.func @conv_relu_gap_kernel(%arg0: i32, %arg1: memref<1x326x4xf32, #tpu.memory_space<vmem>>, %arg2: memref<9x4x128xbf16, #tpu.memory_space<vmem>>, %arg3: memref<1x128xf32, #tpu.memory_space<vmem>>, %arg4: memref<288x1xf32, #tpu.memory_space<vmem>>, %arg5: memref<1x288x128xf32, #tpu.memory_space<vmem>>, %arg6: memref<1x1x128xf32, #tpu.memory_space<vmem>>) attributes {dimension_semantics = [#tpu.dimension_semantics<parallel>], iteration_bounds = array<i64: 4>, scalar_prefetch = 0 : i64, scratch_operands = 0 : i64, tpu.core_type = #tpu.core_type<tc>, window_params = [{transform_indices = @transform_0, window_bounds = array<i64: 1, 326, 4>}, {pipeline_mode = #tpu.pipeline_mode<synchronous>, transform_indices = @transform_1, window_bounds = array<i64: 9, 4, 128>}, {pipeline_mode = #tpu.pipeline_mode<synchronous>, transform_indices = @transform_2, window_bounds = array<i64: 1, 128>}, {pipeline_mode = #tpu.pipeline_mode<synchronous>, transform_indices = @transform_3, window_bounds = array<i64: 288, 1>}, {transform_indices = @transform_4, window_bounds = array<i64: 1, 288, 128>}, {transform_indices = @transform_5, window_bounds = array<i64: 1, 1, 128>}]} {
    %c0 = arith.constant 0 : index
    %c0_0 = arith.constant 0 : index
    %c0_1 = arith.constant 0 : index
    %0 = vector.load %arg1[%c0, %c0_0, %c0_1] : memref<1x326x4xf32, #tpu.memory_space<vmem>>, vector<1x326x4xf32>
    %1 = vector.shape_cast %0 : vector<1x326x4xf32> to vector<326x4xf32>
    %cst = arith.constant 0.000000e+00 : f32
    %2 = vector.broadcast %cst : f32 to vector<288x128xf32>
    %3 = vector.extract_strided_slice %1 {offsets = [0, 0], sizes = [288, 4], strides = [1, 1]} : vector<326x4xf32> to vector<288x4xf32>
    %4 = arith.truncf %3 : vector<288x4xf32> to vector<288x4xbf16>
    %c0_2 = arith.constant 0 : index
    %c0_3 = arith.constant 0 : index
    %c0_4 = arith.constant 0 : index
    %5 = vector.load %arg2[%c0_2, %c0_3, %c0_4] : memref<9x4x128xbf16, #tpu.memory_space<vmem>>, vector<1x4x128xbf16>
    %6 = vector.shape_cast %5 : vector<1x4x128xbf16> to vector<4x128xbf16>
    %cst_5 = arith.constant dense<0.000000e+00> : vector<288x128xf32>
    %7 = tpu.matmul %4, %6, %cst_5 {dimension_numbers = #tpu.dot_dimension_numbers<[1], [0], [0], [1], [0, 0, 1, 1], [], []>} : vector<288x4xbf16>, vector<4x128xbf16>, vector<288x128xf32> -> vector<288x128xf32>
    %8 = arith.addf %2, %7 : vector<288x128xf32>
    %9 = vector.extract_strided_slice %1 {offsets = [1, 0], sizes = [288, 4], strides = [1, 1]} : vector<326x4xf32> to vector<288x4xf32>
    %10 = arith.truncf %9 : vector<288x4xf32> to vector<288x4xbf16>
    %c1 = arith.constant 1 : index
    %c0_6 = arith.constant 0 : index
    %c0_7 = arith.constant 0 : index
    %11 = vector.load %arg2[%c1, %c0_6, %c0_7] : memref<9x4x128xbf16, #tpu.memory_space<vmem>>, vector<1x4x128xbf16>
    %12 = vector.shape_cast %11 : vector<1x4x128xbf16> to vector<4x128xbf16>
    %cst_8 = arith.constant dense<0.000000e+00> : vector<288x128xf32>
    %13 = tpu.matmul %10, %12, %cst_8 {dimension_numbers = #tpu.dot_dimension_numbers<[1], [0], [0], [1], [0, 0, 1, 1], [], []>} : vector<288x4xbf16>, vector<4x128xbf16>, vector<288x128xf32> -> vector<288x128xf32>
    %14 = arith.addf %8, %13 : vector<288x128xf32>
    %15 = vector.extract_strided_slice %1 {offsets = [2, 0], sizes = [288, 4], strides = [1, 1]} : vector<326x4xf32> to vector<288x4xf32>
    %16 = arith.truncf %15 : vector<288x4xf32> to vector<288x4xbf16>
    %c2 = arith.constant 2 : index
    %c0_9 = arith.constant 0 : index
    %c0_10 = arith.constant 0 : index
    %17 = vector.load %arg2[%c2, %c0_9, %c0_10] : memref<9x4x128xbf16, #tpu.memory_space<vmem>>, vector<1x4x128xbf16>
    %18 = vector.shape_cast %17 : vector<1x4x128xbf16> to vector<4x128xbf16>
    %cst_11 = arith.constant dense<0.000000e+00> : vector<288x128xf32>
    %19 = tpu.matmul %16, %18, %cst_11 {dimension_numbers = #tpu.dot_dimension_numbers<[1], [0], [0], [1], [0, 0, 1, 1], [], []>} : vector<288x4xbf16>, vector<4x128xbf16>, vector<288x128xf32> -> vector<288x128xf32>
    %20 = arith.addf %14, %19 : vector<288x128xf32>
    %21 = vector.extract_strided_slice %1 {offsets = [18, 0], sizes = [288, 4], strides = [1, 1]} : vector<326x4xf32> to vector<288x4xf32>
    %22 = arith.truncf %21 : vector<288x4xf32> to vector<288x4xbf16>
    %c3 = arith.constant 3 : index
    %c0_12 = arith.constant 0 : index
    %c0_13 = arith.constant 0 : index
    %23 = vector.load %arg2[%c3, %c0_12, %c0_13] : memref<9x4x128xbf16, #tpu.memory_space<vmem>>, vector<1x4x128xbf16>
    %24 = vector.shape_cast %23 : vector<1x4x128xbf16> to vector<4x128xbf16>
    %cst_14 = arith.constant dense<0.000000e+00> : vector<288x128xf32>
    %25 = tpu.matmul %22, %24, %cst_14 {dimension_numbers = #tpu.dot_dimension_numbers<[1], [0], [0], [1], [0, 0, 1, 1], [], []>} : vector<288x4xbf16>, vector<4x128xbf16>, vector<288x128xf32> -> vector<288x128xf32>
    %26 = arith.addf %20, %25 : vector<288x128xf32>
    %27 = vector.extract_strided_slice %1 {offsets = [19, 0], sizes = [288, 4], strides = [1, 1]} : vector<326x4xf32> to vector<288x4xf32>
    %28 = arith.truncf %27 : vector<288x4xf32> to vector<288x4xbf16>
    %c4 = arith.constant 4 : index
    %c0_15 = arith.constant 0 : index
    %c0_16 = arith.constant 0 : index
    %29 = vector.load %arg2[%c4, %c0_15, %c0_16] : memref<9x4x128xbf16, #tpu.memory_space<vmem>>, vector<1x4x128xbf16>
    %30 = vector.shape_cast %29 : vector<1x4x128xbf16> to vector<4x128xbf16>
    %cst_17 = arith.constant dense<0.000000e+00> : vector<288x128xf32>
    %31 = tpu.matmul %28, %30, %cst_17 {dimension_numbers = #tpu.dot_dimension_numbers<[1], [0], [0], [1], [0, 0, 1, 1], [], []>} : vector<288x4xbf16>, vector<4x128xbf16>, vector<288x128xf32> -> vector<288x128xf32>
    %32 = arith.addf %26, %31 : vector<288x128xf32>
    %33 = vector.extract_strided_slice %1 {offsets = [20, 0], sizes = [288, 4], strides = [1, 1]} : vector<326x4xf32> to vector<288x4xf32>
    %34 = arith.truncf %33 : vector<288x4xf32> to vector<288x4xbf16>
    %c5 = arith.constant 5 : index
    %c0_18 = arith.constant 0 : index
    %c0_19 = arith.constant 0 : index
    %35 = vector.load %arg2[%c5, %c0_18, %c0_19] : memref<9x4x128xbf16, #tpu.memory_space<vmem>>, vector<1x4x128xbf16>
    %36 = vector.shape_cast %35 : vector<1x4x128xbf16> to vector<4x128xbf16>
    %cst_20 = arith.constant dense<0.000000e+00> : vector<288x128xf32>
    %37 = tpu.matmul %34, %36, %cst_20 {dimension_numbers = #tpu.dot_dimension_numbers<[1], [0], [0], [1], [0, 0, 1, 1], [], []>} : vector<288x4xbf16>, vector<4x128xbf16>, vector<288x128xf32> -> vector<288x128xf32>
    %38 = arith.addf %32, %37 : vector<288x128xf32>
    %39 = vector.extract_strided_slice %1 {offsets = [36, 0], sizes = [288, 4], strides = [1, 1]} : vector<326x4xf32> to vector<288x4xf32>
    %40 = arith.truncf %39 : vector<288x4xf32> to vector<288x4xbf16>
    %c6 = arith.constant 6 : index
    %c0_21 = arith.constant 0 : index
    %c0_22 = arith.constant 0 : index
    %41 = vector.load %arg2[%c6, %c0_21, %c0_22] : memref<9x4x128xbf16, #tpu.memory_space<vmem>>, vector<1x4x128xbf16>
    %42 = vector.shape_cast %41 : vector<1x4x128xbf16> to vector<4x128xbf16>
    %cst_23 = arith.constant dense<0.000000e+00> : vector<288x128xf32>
    %43 = tpu.matmul %40, %42, %cst_23 {dimension_numbers = #tpu.dot_dimension_numbers<[1], [0], [0], [1], [0, 0, 1, 1], [], []>} : vector<288x4xbf16>, vector<4x128xbf16>, vector<288x128xf32> -> vector<288x128xf32>
    %44 = arith.addf %38, %43 : vector<288x128xf32>
    %45 = vector.extract_strided_slice %1 {offsets = [37, 0], sizes = [288, 4], strides = [1, 1]} : vector<326x4xf32> to vector<288x4xf32>
    %46 = arith.truncf %45 : vector<288x4xf32> to vector<288x4xbf16>
    %c7 = arith.constant 7 : index
    %c0_24 = arith.constant 0 : index
    %c0_25 = arith.constant 0 : index
    %47 = vector.load %arg2[%c7, %c0_24, %c0_25] : memref<9x4x128xbf16, #tpu.memory_space<vmem>>, vector<1x4x128xbf16>
    %48 = vector.shape_cast %47 : vector<1x4x128xbf16> to vector<4x128xbf16>
    %cst_26 = arith.constant dense<0.000000e+00> : vector<288x128xf32>
    %49 = tpu.matmul %46, %48, %cst_26 {dimension_numbers = #tpu.dot_dimension_numbers<[1], [0], [0], [1], [0, 0, 1, 1], [], []>} : vector<288x4xbf16>, vector<4x128xbf16>, vector<288x128xf32> -> vector<288x128xf32>
    %50 = arith.addf %44, %49 : vector<288x128xf32>
    %51 = vector.extract_strided_slice %1 {offsets = [38, 0], sizes = [288, 4], strides = [1, 1]} : vector<326x4xf32> to vector<288x4xf32>
    %52 = arith.truncf %51 : vector<288x4xf32> to vector<288x4xbf16>
    %c8 = arith.constant 8 : index
    %c0_27 = arith.constant 0 : index
    %c0_28 = arith.constant 0 : index
    %53 = vector.load %arg2[%c8, %c0_27, %c0_28] : memref<9x4x128xbf16, #tpu.memory_space<vmem>>, vector<1x4x128xbf16>
    %54 = vector.shape_cast %53 : vector<1x4x128xbf16> to vector<4x128xbf16>
    %cst_29 = arith.constant dense<0.000000e+00> : vector<288x128xf32>
    %55 = tpu.matmul %52, %54, %cst_29 {dimension_numbers = #tpu.dot_dimension_numbers<[1], [0], [0], [1], [0, 0, 1, 1], [], []>} : vector<288x4xbf16>, vector<4x128xbf16>, vector<288x128xf32> -> vector<288x128xf32>
    %56 = arith.addf %50, %55 : vector<288x128xf32>
    %c0_30 = arith.constant 0 : index
    %c0_31 = arith.constant 0 : index
    %57 = vector.load %arg3[%c0_30, %c0_31] : memref<1x128xf32, #tpu.memory_space<vmem>>, vector<1x128xf32>
    %58 = vector.broadcast %57 : vector<1x128xf32> to vector<288x128xf32>
    %59 = arith.addf %56, %58 : vector<288x128xf32>
    %cst_32 = arith.constant 0.000000e+00 : f32
    %60 = vector.broadcast %cst_32 : f32 to vector<288x128xf32>
    %61 = arith.maximumf %59, %60 : vector<288x128xf32>
    %c0_33 = arith.constant 0 : index
    %c0_34 = arith.constant 0 : index
    %c0_35 = arith.constant 0 : index
    %62 = vector.load %arg5[%c0_33, %c0_34, %c0_35] : memref<1x288x128xf32, #tpu.memory_space<vmem>>, vector<1x288x128xf32>
    %63 = vector.shape_cast %62 : vector<1x288x128xf32> to vector<288x128xf32>
    %64 = vector.shape_cast %61 : vector<288x128xf32> to vector<1x288x128xf32>
    tpu.vector_store %arg5[%c0_33, %c0_34, %c0_35], %64 {strides = array<i32>} : memref<1x288x128xf32, #tpu.memory_space<vmem>>, vector<1x288x128xf32>,
    %c0_36 = arith.constant 0 : index
    %c0_37 = arith.constant 0 : index
    %65 = vector.load %arg4[%c0_36, %c0_37] : memref<288x1xf32, #tpu.memory_space<vmem>>, vector<288x1xf32>
    %66 = vector.broadcast %65 : vector<288x1xf32> to vector<288x128xf32>
    %67 = arith.mulf %61, %66 : vector<288x128xf32>
    %cst_38 = arith.constant dense<0.000000e+00> : vector<128xf32>
    %68 = vector.multi_reduction <add>, %67, %cst_38 [0] : vector<288x128xf32> to vector<128xf32>
    %69 = vector.shape_cast %68 : vector<128xf32> to vector<1x128xf32>
    %c0_39 = arith.constant 0 : index
    %c0_40 = arith.constant 0 : index
    %c0_41 = arith.constant 0 : index
    %70 = vector.load %arg6[%c0_39, %c0_40, %c0_41] : memref<1x1x128xf32, #tpu.memory_space<vmem>>, vector<1x1x128xf32>
    %71 = vector.shape_cast %70 : vector<1x1x128xf32> to vector<1x128xf32>
    %72 = vector.shape_cast %69 : vector<1x128xf32> to vector<1x1x128xf32>
    tpu.vector_store %arg6[%c0_39, %c0_40, %c0_41], %72 {strides = array<i32>} : memref<1x1x128xf32, #tpu.memory_space<vmem>>, vector<1x1x128xf32>,
    return
  }
  func.func @transform_0(%arg0: i32) -> (i32, i32, i32) {
    %c0_i32 = arith.constant 0 : i32
    %c0_i32_0 = arith.constant 0 : i32
    %c0_i32_1 = arith.constant 0 : i32
    return %arg0, %c0_i32, %c0_i32_0 : i32, i32, i32
  }
  func.func @transform_1(%arg0: i32) -> (i32, i32, i32) {
    %c0_i32 = arith.constant 0 : i32
    %c0_i32_0 = arith.constant 0 : i32
    %c0_i32_1 = arith.constant 0 : i32
    %c0_i32_2 = arith.constant 0 : i32
    return %c0_i32, %c0_i32_0, %c0_i32_1 : i32, i32, i32
  }
  func.func @transform_2(%arg0: i32) -> (i32, i32) {
    %c0_i32 = arith.constant 0 : i32
    %c0_i32_0 = arith.constant 0 : i32
    %c0_i32_1 = arith.constant 0 : i32
    return %c0_i32, %c0_i32_0 : i32, i32
  }
  func.func @transform_3(%arg0: i32) -> (i32, i32) {
    %c0_i32 = arith.constant 0 : i32
    %c0_i32_0 = arith.constant 0 : i32
    %c0_i32_1 = arith.constant 0 : i32
    return %c0_i32, %c0_i32_0 : i32, i32
  }
  func.func @transform_4(%arg0: i32) -> (i32, i32, i32) {
    %c0_i32 = arith.constant 0 : i32
    %c0_i32_0 = arith.constant 0 : i32
    %c0_i32_1 = arith.constant 0 : i32
    return %arg0, %c0_i32, %c0_i32_0 : i32, i32, i32
  }
  func.func @transform_5(%arg0: i32) -> (i32, i32, i32) {
    %c0_i32 = arith.constant 0 : i32
    %c0_i32_0 = arith.constant 0 : i32
    %c0_i32_1 = arith.constant 0 : i32
    return %arg0, %c0_i32, %c0_i32_0 : i32, i32, i32
  }
}

</mosaic_0001>

<bundles_post_ra>
// kernel: tpu_custom_call.1
= control target key start
LH: loop header
LB: loop body
LE: loop exit
PB: predicated region body
PF: predicated region fallthrough
CT: control target
= control target key end

     0   :  { %11 = vsyncpa [#allocation3], 0  ;;  %s4558_s0 = inlined_call_operand.vmem [shape: f32[4,326,4], index: 0, kind: input, shape index: {}]   ;;  %s4559_s1 = inlined_call_operand.vmem [shape: bf16[9,4,128], index: 1, kind: input, shape index: {}]   ;;  %s4560_s2 = inlined_call_operand.vmem [shape: f32[1,128], index: 2, kind: input, shape index: {}]   ;;  %s4561_s3 = inlined_call_operand.vmem [shape: f32[288,1], index: 3, kind: input, shape index: {}]   ;;  %s4562_s4 = inlined_call_operand.hbm [shape: f32[4,288,128], index: 4, kind: output, shape index: {0}]   ;;  %s4563_s5 = inlined_call_operand.hbm [shape: f32[4,1,128], index: 5, kind: output, shape index: {1}]  }
   0x1   :  { %13 = vsyncpa [#allocation3 + $0x1], 0 }
   0x2   :  { %14 = vsyncpa [#allocation5], 0 }
   0x3   :  { %16 = vsyncpa [#allocation5 + $0x1], 0  ;;  %s3220_s18 = smov 0   ;;  %s3222_s19 = smov 0  }
   0x4   :  { %s3224_s20 = smov 0   ;;  %s3226_s21 = smov 0  }
   0x5 LB: > { %s3241_s22 = sadd.s32 4294967295, %s3185_s21   ;;  %s2854_s23 = sadd.s32 4294967294, %s3185_s21   ;;  %s3185_s21 = sphi %s3226_s21, %s4738_s21   ;;  %s3181_s20 = sphi %s3224_s20, %s4737_s20   ;;  %s3177_s19 = sphi %s3222_s19, %s4736_s19   ;;  %s3173_s18 = sphi %s3220_s18, %s4735_s18  }
   0x6   : > { %s3245_s24 = sadd.s32 1, %s3185_s21   ;;  %s118_s25 = sadd.s32 1, %s3181_s20 }
   0x7   : > { %s115_s26 = ssub.s32 %s3185_s21, %s3245_s24  ;;  %p128_p0 = scmp.ne.s32.totalorder %s3181_s20, %s3177_s19 }
   0x8   : > { %p116_p1 = scmp.eq.s32.totalorder %s115_s26, 0  ;;  %p129_p2 = scmp.eq.s32.totalorder %s3241_s22, 3 }
   0x9   : > { %p134_p3 = scmp.ne.s32.totalorder %s3177_s19, %s3173_s18  ;;  %p135_p4 = scmp.eq.s32.totalorder %s2854_s23, 3 }
   0xa   : > { %s3256_s27 = scalar_select %p116_p1, %s3181_s20, %s118_s25  }
   0xb   : > { %p3258_p5 = por %p129_p2, %p128_p0  ;;  %p3262_p6 = por %p135_p4, %p134_p3 }
   0xc   : > { %p2857_p7 = scmp.ge.s32.totalorder %s3185_s21, 1  ;;  %p196_p8 = scmp.lt.s32.totalorder %s3185_s21, 5 }
   0xe   : > { %p197_p9 = pnand %p2857_p7, %p196_p8 }
  0x10   : > { %200 = sbr.rel (%p197_p9) target bundleno = 849 (0x351), region = 36 }
  0x15   : > { %v2859_v0 = vld [vmem:[%s4559_s1 + $0x2] sm:$0x3]  ;;  %vm501_vm0 = vcmask 1041408   ;;  %p228_p10 = scmp.lt.s32.totalorder %s3241_s22, 3  ;;  %v2896_v2 = vld [vmem:[%s4559_s1 + $0x4] sm:$0x3] }
  0x16   : > { %v503_v1 = vsel %vm501_vm0, %v2859_v0, 0  ;;  %v293_v3 = vld [vmem:[%s4559_s1] sm:$0x3]  ;;  %v856_v4 = vsel %vm501_vm0, %v2896_v2, 0  ;;  %v2934_v6 = vld [vmem:[%s4559_s1 + $0x8] sm:$0x3] }
  0x17   : > { %3032 = vmatpush.bf16.msra.mxu1 %v503_v1  ;;  %3033 = vmatpush.bf16.msra.mxu2 %v503_v1  ;;  %s229_s11 = scalar_select %p228_p10, %s3241_s22, 3  ;;  %v641_v5 = vsel %vm501_vm0, %v293_v3, 0  ;;  %v1290_v7 = vsel %vm501_vm0, %v2934_v6, 0  ;;  %vm297_vm1 = vsmask.f32 7424  ;;  %vm446_vm2 = vcmask 31744  }
  0x18   : > { %512 = vmatpush.bf16.msra.mxu0 %v503_v1  ;;  %3034 = vmatpush.bf16.msra.mxu3 %v503_v1  ;;  %vm763_vm3 = vcmask 1046528   ;;  %vm1149_vm4 = vsmask.f32 6400  ;;  %vm1815_vm5 = vsmask.f32 5376  ;;  %vm1429_vm6 = vcmask 1045504  }
  0x19   : > { %s3036_s14 = smul.u32 328, %s229_s11  ;;  %vm2095_vm7 = vcmask 1044480   ;;  %s4157_s16 = sand.u32 1, %s3177_s19  }
  0x1a   : > { %s3035_s26 = smul.u32 288, %s4157_s16  ;;  %s2732_s12 = scalar_lea.sflag [#allocation3], %s4157_s16 }
  0x1b   : > { %865 = vmatpush.bf16.msrb.mxu2 %v856_v4  ;;  %650 = vmatpush.bf16.msrb.mxu1 %v641_v5  ;;  %s3289_s17 = scalar_lea.vmem %s4558_s0, %s3036_s14  ;;  %v2915_v4 = vld [vmem:[%s4559_s1 + $0x6] sm:$0x3]  ;;  %s3037_s30 = smul.u32 288, %s3241_s22 }
  0x1c   : > { %1299 = vmatpush.bf16.msrb.mxu0 %v1290_v7  ;;  %v244_v8 = vld [vmem:[%s3289_s17 + $0x50] sm:$0xff]  ;;  %v245_v9 = vld [vmem:[%s3289_s17 + $0x58] sm:$0xff]  ;;  %v246_v10 = vld [vmem:[%s3289_s17 + $0x60] sm:$0xff]  ;;  %s4179_s7 = scalar_lea.vmem [#allocation2], %s3035_s26  ;;  %s3111_s25 = scalar_lea.hbm %s4562_s4, 1152 }
  0x1d   : > { %v247_v11 = vld [vmem:[%s3289_s17 + $0x68] sm:$0xff]  ;;  %v3295_v12 = vpack.c.bf16 %v245_v9, %v244_v8  ;;  %v254_v13 = vld [vmem:[%s3289_s17 + $0xa0] sm:$0xff]  ;;  %v256_v16 = vld [vmem:[%s3289_s17 + $0xb0] sm:$0xff]  ;;  %s2747_s9 = scalar_lea.hbm %s4562_s4, %s3037_s30  ;;  %s2748_s10 = sshll.u32 %s4179_s7, 4  ;;  %s2749_s10 = int_to_ptr.vmem [resolvable:$true] %s2748_s10 }
  0x1e   : > { %v255_v14 = vld [vmem:[%s3289_s17 + $0xa8] sm:$0xff]  ;;  %v3299_v15 = vpack.c.bf16 %v247_v11, %v246_v10  ;;  %v257_v17 = vld [vmem:[%s3289_s17 + $0xb8] sm:$0xff]  ;;  %v234_v19 = vld [vmem:[%s3289_s17] sm:$0xff]  ;;  %s2750_s11 = sshll.u32 %s2747_s9, 4  ;;  %s2751_s11 = int_to_ptr.hbm [resolvable:$true] %s2750_s11 }
  0x1f   : > { %4606 = vst [vmem:[#allocation8_spill] sm:$0xff] %v3295_v12  ;;  %v3303_v18 = vpack.c.bf16 %v255_v14, %v254_v13  ;;  %v3307_v20 = vshll.u32 %v3295_v12, 16  ;;  %v3310_v21 = vshrl.u32 %v3295_v12, 16  ;;  %v3312_v22 = vpack.c.bf16 %v257_v17, %v256_v16  ;;  %v235_v23 = vld [vmem:[%s3289_s17 + $0x8] sm:$0xff]  ;;  %v236_v24 = vld [vmem:[%s3289_s17 + $0x10] sm:$0xff]  ;;  %v237_v25 = vld [vmem:[%s3289_s17 + $0x18] sm:$0xff] }
  0x20   : > { %4607 = vst [vmem:[#allocation9_spill] sm:$0xff] %v3299_v15  ;;  %v3318_v26 = vshll.u32 %v3299_v15, 16  ;;  %v3326_v29 = vpack.c.bf16 %v235_v23, %v234_v19  ;;  %v3332_v32 = vpack.c.bf16 %v237_v25, %v236_v24  ;;  %v248_v40 = vld [vmem:[%s3289_s17 + $0x70] sm:$0xff]  ;;  %v249_v41 = vld [vmem:[%s3289_s17 + $0x78] sm:$0xff]  ;;  %v258_v44 = vld [vmem:[%s3289_s17 + $0xc0] sm:$0xff]  ;;  %v3384_v1 = vshrl.u32 %v3299_v15, 16 }
  0x21   : > { %4608 = vst [vmem:[#allocation10_spill] sm:$0xff] %v3307_v20  ;;  %v3321_v27 = vshll.u32 %v3303_v18, 16  ;;  %v3324_v28 = vshrl.u32 %v3303_v18, 16  ;;  %v340_v30 = vrot.slane %v3307_v20, 1  ;;  %v3330_v31 = vshll.u32 %v3312_v22, 16  ;;  %v264_v45 = vld [vmem:[%s3289_s17 + $0xf0] sm:$0xff] }
  0x22   : > { %4609 = vst [vmem:[#allocation11_spill] sm:$0xff] %v3310_v21  ;;  %v348_v33 = vrot.slane %v3318_v26, 1  ;;  %v299_v35 = vshrl.u32 %v3326_v29, 16  ;;  %v301_v36 = vshll.u32 %v3326_v29, 16  ;;  %v4564_v39 = vshll.u32 %v3332_v32, 16  ;;  %v265_v46 = vld [vmem:[%s3289_s17 + $0xf8] sm:$0xff] }
  0x23   : > { %4610 = vst [vmem:[#allocation12_spill] sm:$0xff] %v3318_v26  ;;  %v380_v34 = vrot.slane %v3321_v27, 1  ;;  %v344_v37 = vor.u32 %v3310_v21, %v340_v30  ;;  %v388_v38 = vrot.slane %v3330_v31, 1  ;;  %v259_v49 = vld [vmem:[%s3289_s17 + $0xc8] sm:$0xff]  ;;  %v266_v50 = vld [vmem:[%s3289_s17 + $0x100] sm:$0xff]  ;;  %v3360_v54 = vpack.c.bf16 %v249_v41, %v248_v40  ;;  %v268_v9 = vld [vmem:[%s3289_s17 + $0x110] sm:$0xff] }
  0x24   : > { %4611 = vst [vmem:[#allocation13_spill] sm:$0xff] %v3321_v27  ;;  %v303_v43 = vrot.slane %v301_v36, 1  ;;  %v308_v48 = vrot.slane %v4564_v39, 1  ;;  %v267_v51 = vld [vmem:[%s3289_s17 + $0x108] sm:$0xff]  ;;  %v238_v55 = vld [vmem:[%s3289_s17 + $0x20] sm:$0xff]  ;;  %v3364_v57 = vpack.c.bf16 %v265_v46, %v264_v45  ;;  %v3367_v59 = vpack.c.bf16 %v259_v49, %v258_v44  ;;  %v269_v14 = vld [vmem:[%s3289_s17 + $0x118] sm:$0xff] }
  0x25   : > { %4612 = vst [vmem:[#allocation14_spill] sm:$0xff] %v3324_v28  ;;  %v384_v42 = vor.u32 %v3324_v28, %v380_v34  ;;  %v349_v47 = vsel %vm297_vm1, %v344_v37, %v348_v33  ;;  %v239_v56 = vld [vmem:[%s3289_s17 + $0x28] sm:$0xff]  ;;  %v3369_v60 = vpack.c.bf16 %v267_v51, %v266_v50  ;;  %v3387_v2 = vshll.u32 %v3360_v54, 16  ;;  %v252_v16 = vld [vmem:[%s3289_s17 + $0x90] sm:$0xff]  ;;  %v253_v17 = vld [vmem:[%s3289_s17 + $0x98] sm:$0xff]  ;;  %s3105_s13 = sshra.s32 %s2751_s11, 4  ;;  %s3106_s13 = int_to_ptr.hbm [resolvable:$true] %s3105_s13 }
  0x26   : > { %4613 = vst [vmem:[#allocation15_spill] sm:$0xff] %v3332_v32  ;;  %2865 = vmatmul.msk.bf16.vlgmr.msra.gmra.mxu1 %vm446_vm2, %v349_v47  ;;  %v304_v53 = vor.u32 %v303_v43, %v299_v35  ;;  %v3373_v61 = vshll.u32 %v3364_v57, 16  ;;  %v3376_v62 = vshrl.u32 %v3364_v57, 16  ;;  %v3378_v63 = vpack.c.bf16 %v239_v56, %v238_v55  ;;  %v251_v43 = vld [vmem:[%s3289_s17 + $0x88] sm:$0xff]  ;;  %v260_v44 = vld [vmem:[%s3289_s17 + $0xd0] sm:$0xff]  ;;  %v261_v45 = vld [vmem:[%s3289_s17 + $0xd8] sm:$0xff]  ;;  %p3112_p0 = scmp.lt.s32.totalorder %s3106_s13, %s4562_s4 }
  0x27   : > { %v389_v52 = vsel %vm297_vm1, %v384_v42, %v388_v38  ;;  %4614 = vst [vmem:[#allocation16_spill] sm:$0xff] %v3360_v54  ;;  %v3381_v0 = vshll.u32 %v3369_v60, 16  ;;  %v3394_v5 = vshrl.u32 %v3312_v22, 16  ;;  %v3397_v6 = vshll.u32 %v3367_v59, 16  ;;  %v240_v51 = vld [vmem:[%s3289_s17 + $0x30] sm:$0xff]  ;;  %s3107_s14 = scalar_lea.hbm %s3106_s13, 288 }
  0x28   : > { %2870 = vmatmul.msk.bf16.vlgmr.msra.gmra.mxu2 %vm446_vm2, %v389_v52  ;;  %v309_v58 = vsel %vm297_vm1, %v304_v53, %v308_v48  ;;  %4615 = vst [vmem:[#allocation17_spill] sm:$0xff] %v3378_v63  ;;  %v4566_v3 = vrot.slane %v3373_v61, 1  ;;  %v4565_v10 = vshrl.u32 %v3332_v32, 16  ;;  %v3406_v11 = vshll.u32 %v3378_v63, 16  ;;  %v241_v52 = vld [vmem:[%s3289_s17 + $0x38] sm:$0xff]  ;;  %p3108_p11 = scmp.ne.s32.totalorder %s3106_s13, %s3107_s14  ;;  %p3113_p1 = scmp.lt.s32.totalorder %s3111_s25, %s3107_s14 }
  0x29   : > { %2860 = vmatmul.msk.bf16.vlgmr.msra.gmra.mxu0 %vm446_vm2, %v309_v58  ;;  %4616 = vst [vmem:[#allocation18_spill] sm:$0xff] %v3384_v1  ;;  %v428_v7 = vrot.slane %v3381_v0, 1  ;;  %v1010_v13 = vsel %vm501_vm0, %v2915_v4, 0  ;;  %v352_v19 = vor.u32 %v3384_v1, %v348_v33  ;;  %v356_v23 = vrot.slane %v3387_v2, 1  ;;  %v242_v4 = vld [vmem:[%s3289_s17 + $0x40] sm:$0xff] }
  0x2a   : > { %4617 = vst [vmem:[#allocation19_spill] sm:$0xff] %v3387_v2  ;;  %v424_v8 = vor.u32 %v3376_v62, %v4566_v3  ;;  %1019 = vmatpush.bf16.msrb.mxu3 %v1010_v13  ;;  %v392_v25 = vor.u32 %v3394_v5, %v388_v38  ;;  %v396_v35 = vrot.slane %v3397_v6, 1  ;;  %v3418_v36 = vpack.c.bf16 %v269_v14, %v268_v9  ;;  %v250_v38 = vld [vmem:[%s3289_s17 + $0x80] sm:$0xff]  ;;  %p3109_p12 = pnand %p3108_p11, %p3258_p5  ;;  %p3114_p2 = por %p3113_p1, %p3112_p0 }
  0x2b   : > { %4618 = vst [vmem:[#allocation20_spill] sm:$0xff] %v3394_v5  ;;  %v3420_v37 = vpack.c.bf16 %v253_v17, %v252_v16  ;;  %v312_v33 = vor.u32 %v4565_v10, %v308_v48  ;;  %v316_v40 = vrot.slane %v3406_v11, 1  ;;  %v357_v41 = vsel %vm297_vm1, %v352_v19, %v356_v23 }
  0x2c   : > { %4619 = vst [vmem:[#allocation21_spill] sm:$0xff] %v3406_v11  ;;  %v429_v24 = vsel %vm297_vm1, %v424_v8, %v428_v7  ;;  %v397_v42 = vsel %vm297_vm1, %v392_v25, %v396_v35  ;;  %v3432_v46 = vshrl.u32 %v3369_v60, 16  ;;  %v3435_v47 = vshll.u32 %v3418_v36, 16  ;;  %v243_v8 = vld [vmem:[%s3289_s17 + $0x48] sm:$0xff]  ;;  %p3110_p13 = pneg %p3109_p12 }
  0x2d   : > { %2875 = vmatmul.msk.bf16.vlgmr.msra.gmra.mxu3 %vm446_vm2, %v429_v24  ;;  %v3438_v48 = vshll.u32 %v3420_v37, 16  ;;  %v317_v49 = vsel %vm297_vm1, %v312_v33, %v316_v40  ;;  %v3443_v50 = vpack.c.bf16 %v251_v43, %v250_v38  ;;  %v3447_v53 = vpack.c.bf16 %v261_v45, %v260_v44  ;;  %v3488_v38 = vld [vmem:[%s3289_s17 + $0x120] sm:$0xff] }
  0x2e   : > { %4620 = vst [vmem:[#allocation22_spill] sm:$0xff] %v3435_v47  ;;  %v432_v55 = vor.u32 %v3432_v46, %v428_v7  ;;  %v436_v56 = vrot.slane %v3435_v47, 1  ;;  %v3456_v9 = vshrl.u32 %v3420_v37, 16  ;;  %v3458_v13 = vpack.c.bf16 %v241_v52, %v240_v51  ;;  %p3115_p3 = pnand %p3114_p2, %p3110_p13 }
  0x2f   : > { %4621 = vst [vmem:[#allocation23_spill] sm:$0xff] %v3438_v48  ;;  %v372_v58 = vrot.slane %v3438_v48, 1  ;;  %v3461_v14 = vshrl.u32 %v3360_v54, 16  ;;  %v3464_v16 = vshll.u32 %v3443_v50, 16  ;;  %v3468_v17 = vshrl.u32 %v3367_v59, 16 }
  0x30   : > { %4622 = vst [vmem:[#allocation24_spill] sm:$0xff] %v3443_v50  ;;  %v3471_v19 = vshll.u32 %v3447_v53, 16  ;;  %v3473_v24 = vpack.c.bf16 %v243_v8, %v242_v4  ;;  %v437_v25 = vsel %vm297_vm1, %v432_v55, %v436_v56  ;;  %v3500_v51 = vpack.c.bf16 %v3488_v38, %v3488_v38 }
  0x31   : > { %4623 = vst [vmem:[#allocation25_spill] sm:$0xff] %v3456_v9  ;;  %v376_v7 = vor.u32 %v3456_v9, %v372_v58  ;;  %v360_v43 = vor.u32 %v3461_v14, %v356_v23  ;;  %v364_v44 = vrot.slane %v3464_v16, 1  ;;  %v400_v45 = vor.u32 %v3468_v17, %v396_v35 }
  0x32   : > { %4624 = vst [vmem:[#allocation26_spill] sm:$0xff] %v3458_v13  ;;  %v3508_v8 = vshrl.u32 %v3473_v24, 16  ;;  %v3513_v39 = vshrl.u32 %v3418_v36, 16  ;;  %v442_v10 = vshll.u32 %v3500_v51, 16 }
  0x33   : > { %4625 = vst [vmem:[#allocation27_spill] sm:$0xff] %v3461_v14  ;;  %v3479_v33 = vsel %vm297_vm1, %v376_v7, %v380_v34  ;;  %v3496_v34 = vshll.u32 %v3473_v24, 16  ;;  %v365_v23 = vsel %vm297_vm1, %v360_v43, %v364_v44  ;;  %v262_v7 = vld [vmem:[%s3289_s17 + $0xe0] sm:$0xff] }
  0x34   : > { %4626 = vst [vmem:[#allocation28_spill] sm:$0xff] %v3464_v16  ;;  %v440_v47 = vor.u32 %v3513_v39, %v436_v56 }
  0x35   : > { %4627 = vst [vmem:[#allocation29_spill] sm:$0xff] %v3473_v24  ;;  %v332_v35 = vrot.slane %v3496_v34, 1 }
  0x36   : > { %2866 = vmatmul.msk.bf16.gmra.mxu1 %vm446_vm2, %v357_v41  ;;  %v3482_v41 = vshrl.u32 %v3378_v63, 16  ;;  %4628 = vst [vmem:[#allocation30_spill] sm:$0xff] %v3488_v38  ;;  %v444_v38 = vrot.slane %v442_v10, 1 }
  0x37   : > { %4629 = vst [vmem:[#allocation31_spill] sm:$0xff] %v3496_v34  ;;  %v336_v43 = vor.u32 %v3508_v8, %v332_v35 }
  0x38   : > { %2871 = vmatmul.msk.bf16.gmra.mxu2 %vm446_vm2, %v397_v42  ;;  %v3485_v42 = vshll.u32 %v3458_v13, 16  ;;  %4630 = vst [vmem:[#allocation32_spill] sm:$0xff] %v3500_v51  ;;  %v320_v52 = vor.u32 %v3482_v41, %v316_v40  ;;  %v3528_v51 = vshrl.u32 %v3443_v50, 16 }
  0x39   : > { %2861 = vmatmul.msk.bf16.gmra.mxu0 %vm446_vm2, %v317_v49  ;;  %v404_v49 = vrot.slane %v3471_v19, 1  ;;  %4631 = vst [vmem:[#allocation33_spill] sm:$0xff] %v3508_v8  ;;  %v341_v3 = vsel %vm297_vm1, %v336_v43, %v340_v30 }
  0x3a   : > { %v324_v55 = vrot.slane %v3485_v42, 1  ;;  %4632 = vst [vmem:[#allocation34_spill] sm:$0xff] %v3528_v51  ;;  %v368_v30 = vor.u32 %v3528_v51, %v364_v44 }
  0x3b   : > { %v405_v4 = vsel %vm297_vm1, %v400_v45, %v404_v49 }
  0x3c   : > { %v325_v40 = vsel %vm297_vm1, %v320_v52, %v324_v55  ;;  %v3531_v52 = vshrl.u32 %v3447_v53, 16 }
  0x3d   : > { %2876 = vmatmul.msk.bf16.gmra.mxu3 %vm446_vm2, %v437_v25  ;;  %v263_v25 = vld [vmem:[%s3289_s17 + $0xe8] sm:$0xff] }
  0x3e   : > { %v3520_v45 = vpack.c.bf16 %v263_v25, %v262_v7  ;;  %v3538_v7 = vshrl.u32 %v3458_v13, 16  ;;  %v408_v25 = vor.u32 %v3531_v52, %v404_v49  ;;  %v765_v49 = vrot.slane %v3332_v32, 1 }
  0x40   : > { %v328_v56 = vor.u32 %v3538_v7, %v324_v55  ;;  %v2991_v55 = vld [vmem:[%s4559_s1 + $0xe] sm:$0x3] }
  0x46   : > { %2867 = vmatmul.msk.bf16.gmra.mxu1 %vm446_vm2, %v365_v23  ;;  %v3534_v23 = vshll.u32 %v3520_v45, 16 }
  0x48   : > { %2872 = vmatmul.msk.bf16.gmra.mxu2 %vm446_vm2, %v405_v4  ;;  %v445_v4 = vsel %vm297_vm1, %v440_v47, %v444_v38  ;;  %v412_v10 = vrot.slane %v3534_v23, 1  ;;  %v333_v47 = vsel %vm297_vm1, %v328_v56, %v332_v35  ;;  %v2972_v38 = vld [vmem:[%s4559_s1 + $0xc] sm:$0x3]  ;;  %v2953_v35 = vld [vmem:[%s4559_s1 + $0xa] sm:$0x3] }
  0x49   : > { %2862 = vmatmul.msk.bf16.gmra.mxu0 %vm446_vm2, %v325_v40  ;;  %v373_v40 = vsel %vm297_vm1, %v368_v30, %v372_v58  ;;  %v1676_v44 = vsel %vm501_vm0, %v2972_v38, 0  ;;  %v767_v58 = vrot.slane %v3378_v63, 1  ;;  %v1522_v30 = vsel %vm501_vm0, %v2953_v35, 0 }
  0x4a   : > { %v413_v43 = vsel %vm297_vm1, %v408_v25, %v412_v10  ;;  %1685 = vmatpush.bf16.msra.mxu2 %v1676_v44  ;;  %v3010_v25 = vld [vmem:[%s4559_s1 + $0x10] sm:$0x3]  ;;  %1531 = vmatpush.bf16.msra.mxu1 %v1522_v30  ;;  %v4633_v38 = vrot.slane %v3373_v61, 1  ;;  %v4635_v30 = vshll.u32 %v3332_v32, 16 }
  0x4b   : > { %v2188_v56 = vsel %vm501_vm0, %v3010_v25, 0 }
  0x4c   : > { %2197 = vmatpush.bf16.msra.mxu0 %v2188_v56  ;;  %v1151_v25 = vrot.slane %v4635_v30, 2  ;;  %v1153_v56 = vrot.slane %v3482_v41, 1 }
  0x4d   : > { %2877 = vmatmul.msk.bf16.gmra.mxu3 %vm446_vm2, %v445_v4  ;;  %v1956_v4 = vsel %vm501_vm0, %v2991_v55, 0  ;;  %v769_v55 = vrot.slane %v3458_v13, 1 }
  0x4e   : > { %1965 = vmatpush.bf16.msra.mxu3 %v1956_v4  ;;  %v4634_v4 = vshrl.u32 %v3332_v32, 16 }
  0x4f   : > { %v770_v35 = vsel %vm763_vm3, %v767_v58, %v769_v55 }
  0x56   : > { %2868 = vmatmul.msk.bf16.gmra.mxu1 %vm446_vm2, %v373_v40  ;;  %v3570_v40 = vshrl.u32 %v3520_v45, 16 }
  0x58   : > { %2873 = vmatmul.msk.bf16.gmra.mxu2 %vm446_vm2, %v413_v43  ;;  %v768_v43 = vsel %vm763_vm3, %v765_v49, %v767_v58 }
  0x59   : > { %2863 = vmatmul.msk.bf16.gmra.mxu0 %vm446_vm2, %v333_v47  ;;  %v416_v47 = vor.u32 %v3570_v40, %v412_v10  ;;  %v1150_v10 = vrot.slane %v4634_v4, 1  ;;  %v771_v4 = vrot.slane %v3473_v24, 1 }
  0x5b   : > { %v421_v44 = vsel %vm297_vm1, %v416_v47, %v4633_v38  ;;  %v1154_v47 = vrot.slane %v3406_v11, 2  ;;  %v1152_v38 = vor.u32 %v1151_v25, %v1150_v10  ;;  %v772_v30 = vsel %vm763_vm3, %v769_v55, %v771_v4 }
  0x5c   : > { %v1157_v11 = vrot.slane %v3538_v7, 1  ;;  %v1158_v10 = vrot.slane %v3485_v42, 2  ;;  %v773_v25 = vrot.slane %v3295_v12, 1 }
  0x5d   : > { %2916 = vmatmul.msk.bf16.vlgmr.msrb.gmra.mxu3 %vm446_vm2, %v768_v43 }
  0x5e   : > { %v774_v55 = vsel %vm763_vm3, %v771_v4, %v773_v25 }
  0x66   : > { %2869 = vmatmul.msk.bf16.gmra.mxu1 %vm446_vm2, %v3479_v33  ;;  %v764_v33 = vrot.slane %v3326_v29, 1 }
  0x68   : > { %2874 = vmatmul.msk.bf16.gmra.mxu2 %vm446_vm2, %v421_v44  ;;  %v766_v44 = vsel %vm763_vm3, %v764_v33, %v765_v49  ;;  %v1159_v49 = vor.u32 %v1158_v10, %v1157_v11 }
  0x69   : > { %2864 = vmatmul.msk.bf16.gmra.mxu0 %vm446_vm2, %v341_v3  ;;  %v1155_v3 = vor.u32 %v1154_v47, %v1153_v56  ;;  %v1161_v56 = vrot.slane %v3508_v8, 1  ;;  %v1162_v47 = vrot.slane %v3496_v34, 2 }
  0x6b   : > { %v1156_v58 = vsel %vm1149_vm4, %v1152_v38, %v1155_v3  ;;  %v1163_v11 = vor.u32 %v1162_v47, %v1161_v56 }
  0x6d   : > { %2917 = vmatmul.msk.bf16.gmra.mxu3 %vm446_vm2, %v770_v35  ;;  %v1164_v33 = vsel %vm1149_vm4, %v1159_v49, %v1163_v11 }
  0x76   : > { %2878 = vmatmul.msk.bf16.vlgmr.msrb.gmra.mxu1 %vm446_vm2, %v3326_v29  ;;  %v1160_v29 = vsel %vm1149_vm4, %v1155_v3, %v1159_v49  ;;  %v1165_v3 = vrot.slane %v3310_v21, 1  ;;  %v777_v49 = vrot.slane %v3360_v54, 1 }
  0x78   : > { %2897 = vmatmul.msk.bf16.vlgmr.msrb.gmra.mxu2 %vm446_vm2, %v766_v44  ;;  %v1166_v44 = vrot.slane %v3307_v20, 2 }
  0x79   : > { %2935 = vmatmul.msk.bf16.vlgmr.msrb.gmra.mxu0 %vm446_vm2, %v1156_v58 }
  0x7a   : > { %v1167_v58 = vor.u32 %v1166_v44, %v1165_v3  ;;  %v1170_v3 = vrot.slane %v3318_v26, 2  ;;  %v779_v26 = vrot.slane %v3443_v50, 1 }
  0x7d   : > { %2918 = vmatmul.msk.bf16.gmra.mxu3 %vm446_vm2, %v772_v30 }
  0x86   : > { %2879 = vmatmul.msk.bf16.gmra.mxu1 %vm446_vm2, %v3332_v32 }
  0x88   : > { %2898 = vmatmul.msk.bf16.gmra.mxu2 %vm446_vm2, %v768_v43  ;;  %v775_v43 = vrot.slane %v3299_v15, 1 }
  0x89   : > { %2936 = vmatmul.msk.bf16.gmra.mxu0 %vm446_vm2, %v1160_v29 }
  0x8a   : > { %v776_v38 = vsel %vm763_vm3, %v773_v25, %v775_v43  ;;  %v778_v56 = vsel %vm763_vm3, %v775_v43, %v777_v49 }
  0x8d   : > { %2919 = vmatmul.msk.bf16.gmra.mxu3 %vm446_vm2, %v774_v55 }
  0x96   : > { %2880 = vmatmul.msk.bf16.gmra.mxu1 %vm446_vm2, %v3378_v63 }
  0x98   : > { %2899 = vmatmul.msk.bf16.gmra.mxu2 %vm446_vm2, %v770_v35  ;;  %v1168_v35 = vsel %vm1149_vm4, %v1163_v11, %v1167_v58 }
  0x99   : > { %2937 = vmatmul.msk.bf16.gmra.mxu0 %vm446_vm2, %v1164_v33  ;;  %v1169_v33 = vrot.slane %v3384_v1, 1 }
  0x9d   : > { %2920 = vmatmul.msk.bf16.gmra.mxu3 %vm446_vm2, %v776_v38 }
  0xa3   : > { %v3623_v4 = vpop.f32.mrf.mxu1 }
  0xa6   : > { %v3625_v10 = vpop.f32.mrf.mxu0  ;;  %2881 = vmatmul.msk.bf16.gmra.mxu1 %vm446_vm2, %v3458_v13 }
  0xa8   : > { %2900 = vmatmul.msk.bf16.gmra.mxu2 %vm446_vm2, %v772_v30  ;;  %v1171_v30 = vor.u32 %v1170_v3, %v1169_v33 }
  0xa9   : > { %2938 = vmatmul.msk.bf16.gmra.mxu0 %vm446_vm2, %v1168_v35 }
  0xaa   : > { %v1172_v43 = vsel %vm1149_vm4, %v1167_v58, %v1171_v30  ;;  %v1174_v58 = vrot.slane %v3387_v2, 2 }
  0xab   : > { %v3633_v29 = vpop.f32.mrf.mxu2  ;;  %v3635_v25 = vpop.f32.mrf.mxu1 }
  0xac   : > { %4636 = vst [vmem:[#allocation35_spill] sm:$0xff] %v3633_v29 }
  0xad   : > { %2921 = vmatmul.msk.bf16.gmra.mxu3 %vm446_vm2, %v778_v56 }
  0xae   : > { %v3638_v47 = vpop.f32.mrf.mxu0 }
  0xb0   : > { %v3647_v35 = vpop.f32.mrf.mxu3 }
  0xb1   : > { %4638 = vst [vmem:[#allocation37_spill] sm:$0xff] %v3647_v35  ;;  %v780_v35 = vsel %vm763_vm3, %v777_v49, %v779_v26 }
  0xb3   : > { %v3643_v11 = vpop.f32.mrf.mxu2  ;;  %v3645_v44 = vpop.f32.mrf.mxu1 }
  0xb4   : > { %4637 = vst [vmem:[#allocation36_spill] sm:$0xff] %v3643_v11 }
  0xb6   : > { %v3649_v29 = vpop.f32.mrf.mxu0  ;;  %2882 = vmatmul.msk.bf16.gmra.mxu1 %vm446_vm2, %v3473_v24  ;;  %v1173_v24 = vrot.slane %v3461_v14, 1 }
  0xb8   : > { %2901 = vmatmul.msk.bf16.gmra.mxu2 %vm446_vm2, %v774_v55  ;;  %v3661_v3 = vpop.f32.mrf.mxu3 }
  0xb9   : > { %2939 = vmatmul.msk.bf16.gmra.mxu0 %vm446_vm2, %v1172_v43  ;;  %4640 = vst [vmem:[#allocation39_spill] sm:$0xff] %v3661_v3  ;;  %v1175_v43 = vor.u32 %v1174_v58, %v1173_v24  ;;  %v781_v3 = vrot.slane %v3420_v37, 1 }
  0xbb   : > { %v3657_v1 = vpop.f32.mrf.mxu2  ;;  %v3659_v33 = vpop.f32.mrf.mxu1  ;;  %v1176_v49 = vsel %vm1149_vm4, %v1171_v30, %v1175_v43  ;;  %v1178_v30 = vrot.slane %v3464_v16, 2 }
  0xbc   : > { %4639 = vst [vmem:[#allocation38_spill] sm:$0xff] %v3657_v1 }
  0xbd   : > { %2922 = vmatmul.msk.bf16.gmra.mxu3 %vm446_vm2, %v780_v35 }
  0xbe   : > { %v3664_v11 = vpop.f32.mrf.mxu0 }
  0xc0   : > { %v3673_v1 = vpop.f32.mrf.mxu3 }
  0xc1   : > { %4642 = vst [vmem:[#allocation41_spill] sm:$0xff] %v3673_v1  ;;  %v782_v1 = vsel %vm763_vm3, %v779_v26, %v781_v3 }
  0xc3   : > { %v3669_v55 = vpop.f32.mrf.mxu2  ;;  %v3671_v20 = vpop.f32.mrf.mxu1 }
  0xc4   : > { %4641 = vst [vmem:[#allocation40_spill] sm:$0xff] %v3669_v55  ;;  %v1177_v55 = vrot.slane %v3528_v51, 1 }
  0xc6   : > { %v3675_v21 = vpop.f32.mrf.mxu0  ;;  %2883 = vmatmul.msk.bf16.gmra.mxu1 %vm446_vm2, %v3295_v12 }
  0xc8   : > { %2902 = vmatmul.msk.bf16.gmra.mxu2 %vm446_vm2, %v776_v38  ;;  %v3687_v58 = vpop.f32.mrf.mxu3 }
  0xc9   : > { %2940 = vmatmul.msk.bf16.gmra.mxu0 %vm446_vm2, %v1176_v49  ;;  %4644 = vst [vmem:[#allocation43_spill] sm:$0xff] %v3687_v58  ;;  %v1179_v49 = vor.u32 %v1178_v30, %v1177_v55  ;;  %v783_v58 = vrot.slane %v3303_v18, 1 }
  0xcb   : > { %v3683_v2 = vpop.f32.mrf.mxu2  ;;  %v3685_v24 = vpop.f32.mrf.mxu1  ;;  %v1180_v26 = vsel %vm1149_vm4, %v1175_v43, %v1179_v49  ;;  %v1182_v43 = vrot.slane %v3438_v48, 2 }
  0xcc   : > { %4643 = vst [vmem:[#allocation42_spill] sm:$0xff] %v3683_v2 }
  0xcd   : > { %2923 = vmatmul.msk.bf16.gmra.mxu3 %vm446_vm2, %v782_v1 }
  0xce   : > { %v3690_v14 = vpop.f32.mrf.mxu0 }
  0xd0   : > { %v3699_v2 = vpop.f32.mrf.mxu3 }
  0xd1   : > { %4646 = vst [vmem:[#allocation45_spill] sm:$0xff] %v3699_v2  ;;  %v784_v2 = vsel %vm763_vm3, %v781_v3, %v783_v58 }
  0xd3   : > { %v3695_v38 = vpop.f32.mrf.mxu2  ;;  %v3697_v12 = vpop.f32.mrf.mxu1 }
  0xd4   : > { %4645 = vst [vmem:[#allocation44_spill] sm:$0xff] %v3695_v38  ;;  %v1181_v38 = vrot.slane %v3456_v9, 1 }
  0xd6   : > { %v3701_v13 = vpop.f32.mrf.mxu0  ;;  %2884 = vmatmul.msk.bf16.gmra.mxu1 %vm446_vm2, %v3299_v15 }
  0xd8   : > { %2903 = vmatmul.msk.bf16.gmra.mxu2 %vm446_vm2, %v778_v56  ;;  %v3713_v30 = vpop.f32.mrf.mxu3 }
  0xd9   : > { %2941 = vmatmul.msk.bf16.gmra.mxu0 %vm446_vm2, %v1180_v26  ;;  %4649 = vst [vmem:[#allocation48_spill] sm:$0xff] %v3713_v30  ;;  %v1183_v26 = vor.u32 %v1182_v43, %v1181_v38  ;;  %v785_v30 = vrot.slane %v3312_v22, 1 }
  0xdb   : > { %v3709_v16 = vpop.f32.mrf.mxu2  ;;  %v3711_v55 = vpop.f32.mrf.mxu1  ;;  %v1184_v3 = vsel %vm1149_vm4, %v1179_v49, %v1183_v26  ;;  %v3738_v43 = vsel %vm763_vm3, %v783_v58, %v785_v30  ;;  %v1186_v49 = vrot.slane %v3321_v27, 2  ;;  %v787_v27 = vrot.slane %v3367_v59, 1 }
  0xdc   : > { %4647 = vst [vmem:[#allocation46_spill] sm:$0xff] %v3709_v16 }
  0xdd   : > { %4648 = vst [vmem:[#allocation47_spill] sm:$0xff] %v3711_v55  ;;  %2924 = vmatmul.msk.bf16.gmra.mxu3 %vm446_vm2, %v784_v2  ;;  %v3756_v8 = vsel %vm763_vm3, %v785_v30, %v787_v27 }
  0xde   : > { %v3716_v51 = vpop.f32.mrf.mxu0 }
  0xe0   : > { %v1021_v16 = vpop.f32.mrf.mxu3 }
  0xe3   : > { %v3721_v56 = vpop.f32.mrf.mxu2  ;;  %v3723_v15 = vpop.f32.mrf.mxu1 }
  0xe4   : > { %4650 = vst [vmem:[#allocation49_spill] sm:$0xff] %v3721_v56 }
  0xe5   : > { %4651 = vst [vmem:[#allocation50_spill] sm:$0xff] %v3723_v15 }
  0xe6   : > { %v3725_v63 = vpop.f32.mrf.mxu0  ;;  %2885 = vmatmul.msk.bf16.gmra.mxu1 %vm446_vm2, %v3360_v54  ;;  %v1185_v54 = vrot.slane %v3324_v28, 1 }
  0xe8   : > { %2904 = vmatmul.msk.bf16.gmra.mxu2 %vm446_vm2, %v780_v35  ;;  %v1023_v38 = vpop.f32.mrf.mxu3 }
  0xe9   : > { %2942 = vmatmul.msk.bf16.gmra.mxu0 %vm446_vm2, %v1184_v3  ;;  %v1187_v3 = vor.u32 %v1186_v49, %v1185_v54 }
  0xeb   : > { %v3733_v48 = vpop.f32.mrf.mxu2  ;;  %v3735_v9 = vpop.f32.mrf.mxu1  ;;  %v1188_v58 = vsel %vm1149_vm4, %v1183_v26, %v1187_v3  ;;  %v1190_v26 = vrot.slane %v3330_v31, 2 }
  0xec   : > { %4652 = vst [vmem:[#allocation51_spill] sm:$0xff] %v3733_v48 }
  0xed   : > { %4653 = vst [vmem:[#allocation52_spill] sm:$0xff] %v3735_v9  ;;  %2925 = vmatmul.msk.bf16.gmra.mxu3 %vm446_vm2, %v3738_v43 }
  0xee   : > { %v3740_v56 = vpop.f32.mrf.mxu0 }
  0xf0   : > { %v1026_v48 = vpop.f32.mrf.mxu3 }
  0xf3   : > { %v3746_v35 = vpop.f32.mrf.mxu2  ;;  %v652_v32 = vpop.f32.mrf.mxu1 }
  0xf4   : > { %4654 = vst [vmem:[#allocation53_spill] sm:$0xff] %v3746_v35  ;;  %v653_v28 = vadd.f32 %v652_v32, %v3625_v10 }
  0xf6   : > { %v1301_v15 = vpop.f32.mrf.mxu0  ;;  %2886 = vmatmul.msk.bf16.gmra.mxu1 %vm446_vm2, %v3443_v50  ;;  %v1189_v50 = vrot.slane %v3394_v5, 1 }
  0xf8   : > { %2905 = vmatmul.msk.bf16.gmra.mxu2 %vm446_vm2, %v782_v1  ;;  %v1028_v54 = vpop.f32.mrf.mxu3 }
  0xf9   : > { %2943 = vmatmul.msk.bf16.gmra.mxu0 %vm446_vm2, %v1188_v58 }
  0xfb   : > { %v867_v9 = vpop.f32.mrf.mxu2  ;;  %v654_v35 = vpop.f32.mrf.mxu1 }
  0xfc   : > { %v957_v34 = vadd.f32 %v867_v9, %v653_v28  ;;  %v655_v32 = vadd.f32 %v654_v35, %v3638_v47  ;;  %v1191_v28 = vor.u32 %v1190_v26, %v1189_v50  ;;  %v789_v50 = vrot.slane %v3447_v53, 1 }
  0xfd   : > { %2926 = vmatmul.msk.bf16.gmra.mxu3 %vm446_vm2, %v3756_v8 }
  0xfe   : > { %v1111_v49 = vadd.f32 %v1021_v16, %v957_v34  ;;  %v1303_v55 = vpop.f32.mrf.mxu0  ;;  %v1192_v5 = vsel %vm1149_vm4, %v1187_v3, %v1191_v28  ;;  %v1193_v3 = vrot.slane %v3468_v17, 1 }
 0x100   : > { %v3760_v1 = vadd.f32 %v1301_v15, %v1111_v49  ;;  %v1031_v16 = vpop.f32.mrf.mxu3 }
 0x103   : > { %v869_v10 = vpop.f32.mrf.mxu2  ;;  %v657_v58 = vpop.f32.mrf.mxu1 }
 0x104   : > { %v958_v9 = vadd.f32 %v869_v10, %v655_v32  ;;  %v658_v49 = vadd.f32 %v657_v58, %v3649_v29  ;;  %v3775_v10 = vsel %vm763_vm3, %v787_v27, %v789_v50 }
 0x106   : > { %v1112_v34 = vadd.f32 %v1023_v38, %v958_v9  ;;  %v1306_v30 = vpop.f32.mrf.mxu0  ;;  %2887 = vmatmul.msk.bf16.gmra.mxu1 %vm446_vm2, %v3420_v37 }
 0x108   : > { %2906 = vmatmul.msk.bf16.gmra.mxu2 %vm446_vm2, %v784_v2  ;;  %v3769_v15 = vadd.f32 %v1303_v55, %v1112_v34  ;;  %v1033_v38 = vpop.f32.mrf.mxu3  ;;  %v1194_v2 = vrot.slane %v3397_v6, 2 }
 0x109   : > { %2944 = vmatmul.msk.bf16.gmra.mxu0 %vm446_vm2, %v1192_v5 }
 0x10a   : > { %v1195_v58 = vor.u32 %v1194_v2, %v1193_v3 }
 0x10b   : > { %v872_v47 = vpop.f32.mrf.mxu2  ;;  %v659_v26 = vpop.f32.mrf.mxu1 }
 0x10c   : > { %v959_v35 = vadd.f32 %v872_v47, %v658_v49  ;;  %v660_v5 = vadd.f32 %v659_v26, %v3664_v11  ;;  %v791_v11 = vrot.slane %v3520_v45, 1 }
 0x10d   : > { %2927 = vmatmul.msk.bf16.gmra.mxu3 %vm446_vm2, %v3775_v10 }
 0x10e   : > { %v1113_v32 = vadd.f32 %v1026_v48, %v959_v35  ;;  %v1308_v9 = vpop.f32.mrf.mxu0  ;;  %v1196_v35 = vsel %vm1149_vm4, %v1191_v28, %v1195_v58 }
 0x110   : > { %v3779_v55 = vadd.f32 %v1306_v30, %v1113_v32  ;;  %v1036_v48 = vpop.f32.mrf.mxu3 }
 0x113   : > { %v874_v29 = vpop.f32.mrf.mxu2  ;;  %v662_v49 = vpop.f32.mrf.mxu1 }
 0x114   : > { %v960_v34 = vadd.f32 %v874_v29, %v660_v5  ;;  %v663_v32 = vadd.f32 %v662_v49, %v3675_v21  ;;  %v3795_v29 = vsel %vm763_vm3, %v789_v50, %v791_v11 }
 0x116   : > { %v1114_v47 = vadd.f32 %v1028_v54, %v960_v34  ;;  %v1311_v27 = vpop.f32.mrf.mxu0  ;;  %2888 = vmatmul.msk.bf16.gmra.mxu1 %vm446_vm2, %v3303_v18  ;;  %v1197_v34 = vrot.slane %v3531_v52, 1 }
 0x118   : > { %2907 = vmatmul.msk.bf16.gmra.mxu2 %vm446_vm2, %v3738_v43  ;;  %v3789_v30 = vadd.f32 %v1308_v9, %v1114_v47  ;;  %v1038_v2 = vpop.f32.mrf.mxu3  ;;  %v1198_v43 = vrot.slane %v3471_v19, 2 }
 0x119   : > { %2945 = vmatmul.msk.bf16.gmra.mxu0 %vm446_vm2, %v1196_v35 }
 0x11a   : > { %v1199_v47 = vor.u32 %v1198_v43, %v1197_v34 }
 0x11b   : > { %v877_v26 = vpop.f32.mrf.mxu2  ;;  %v664_v54 = vpop.f32.mrf.mxu1 }
 0x11c   : > { %v961_v3 = vadd.f32 %v877_v26, %v663_v32  ;;  %v665_v21 = vadd.f32 %v664_v54, %v3690_v14  ;;  %v793_v14 = vrot.slane %v3364_v57, 1 }
 0x11d   : > { %2928 = vmatmul.msk.bf16.gmra.mxu3 %vm446_vm2, %v3795_v29 }
 0x11e   : > { %v1115_v5 = vadd.f32 %v1031_v16, %v961_v3  ;;  %v1313_v28 = vpop.f32.mrf.mxu0  ;;  %v1200_v3 = vsel %vm1149_vm4, %v1195_v58, %v1199_v47 }
 0x120   : > { %v3799_v9 = vadd.f32 %v1311_v27, %v1115_v5  ;;  %v1041_v16 = vpop.f32.mrf.mxu3 }
 0x123   : > { %v879_v49 = vpop.f32.mrf.mxu2  ;;  %v667_v32 = vpop.f32.mrf.mxu1 }
 0x124   : > { %v962_v35 = vadd.f32 %v879_v49, %v665_v21  ;;  %v668_v5 = vadd.f32 %v667_v32, %v3701_v13  ;;  %v3815_v49 = vsel %vm763_vm3, %v791_v11, %v793_v14 }
 0x126   : > { %v1116_v26 = vadd.f32 %v1033_v38, %v962_v35  ;;  %v1316_v50 = vpop.f32.mrf.mxu0  ;;  %2889 = vmatmul.msk.bf16.gmra.mxu1 %vm446_vm2, %v3312_v22  ;;  %v1201_v35 = vrot.slane %v3570_v40, 1 }
 0x128   : > { %2908 = vmatmul.msk.bf16.gmra.mxu2 %vm446_vm2, %v3756_v8  ;;  %v3809_v27 = vadd.f32 %v1313_v28, %v1116_v26  ;;  %v1043_v43 = vpop.f32.mrf.mxu3  ;;  %v1202_v8 = vrot.slane %v3534_v23, 2 }
 0x129   : > { %2946 = vmatmul.msk.bf16.gmra.mxu0 %vm446_vm2, %v1200_v3 }
 0x12a   : > { %v1203_v26 = vor.u32 %v1202_v8, %v1201_v35 }
 0x12b   : > { %v882_v54 = vpop.f32.mrf.mxu2  ;;  %v669_v38 = vpop.f32.mrf.mxu1 }
 0x12c   : > { %v963_v34 = vadd.f32 %v882_v54, %v668_v5  ;;  %v670_v13 = vadd.f32 %v669_v38, %v3716_v51  ;;  %v795_v51 = vrot.slane %v3369_v60, 1 }
 0x12d   : > { %2929 = vmatmul.msk.bf16.gmra.mxu3 %vm446_vm2, %v3815_v49 }
 0x12e   : > { %v1117_v21 = vadd.f32 %v1036_v48, %v963_v34  ;;  %v1318_v58 = vpop.f32.mrf.mxu0  ;;  %v1204_v34 = vsel %vm1149_vm4, %v1199_v47, %v1203_v26 }
 0x130   : > { %v3819_v28 = vadd.f32 %v1316_v50, %v1117_v21  ;;  %v1046_v48 = vpop.f32.mrf.mxu3 }
 0x133   : > { %v884_v32 = vpop.f32.mrf.mxu2  ;;  %v672_v5 = vpop.f32.mrf.mxu1 }
 0x134   : > { %v964_v3 = vadd.f32 %v884_v32, %v670_v13  ;;  %v673_v21 = vadd.f32 %v672_v5, %v3725_v63  ;;  %v3835_v32 = vsel %vm763_vm3, %v793_v14, %v795_v51 }
 0x136   : > { %v1118_v54 = vadd.f32 %v1038_v2, %v964_v3  ;;  %v1321_v11 = vpop.f32.mrf.mxu0  ;;  %2890 = vmatmul.msk.bf16.gmra.mxu1 %vm446_vm2, %v3367_v59  ;;  %v1205_v3 = vrot.slane %v3376_v62, 1 }
 0x138   : > { %2909 = vmatmul.msk.bf16.gmra.mxu2 %vm446_vm2, %v3775_v10  ;;  %v3829_v50 = vadd.f32 %v1318_v58, %v1118_v54  ;;  %v1048_v8 = vpop.f32.mrf.mxu3  ;;  %v1206_v10 = vrot.slane %v3373_v61, 2 }
 0x139   : > { %2947 = vmatmul.msk.bf16.gmra.mxu0 %vm446_vm2, %v1204_v34 }
 0x13a   : > { %v1207_v54 = vor.u32 %v1206_v10, %v1205_v3 }
 0x13b   : > { %v887_v38 = vpop.f32.mrf.mxu2  ;;  %v674_v2 = vpop.f32.mrf.mxu1 }
 0x13c   : > { %v965_v35 = vadd.f32 %v887_v38, %v673_v21  ;;  %v675_v63 = vadd.f32 %v674_v2, %v3740_v56  ;;  %v3854_v2 = vrot.slane %v3418_v36, 1 }
 0x13d   : > { %2930 = vmatmul.msk.bf16.gmra.mxu3 %vm446_vm2, %v3835_v32 }
 0x13e   : > { %v1119_v13 = vadd.f32 %v1041_v16, %v965_v35  ;;  %v1323_v47 = vpop.f32.mrf.mxu0  ;;  %v1208_v35 = vsel %vm1149_vm4, %v1203_v26, %v1207_v54  ;;  %v3858_v26 = vsel %vm763_vm3, %v795_v51, %v3854_v2  ;;  %v4658_v51 = vld [vmem:[#allocation30_spill] sm:$0xff] }
 0x140   : > { %v3839_v58 = vadd.f32 %v1321_v11, %v1119_v13  ;;  %v1051_v16 = vpop.f32.mrf.mxu3 }
 0x142   : > { %4655 = vst [vmem:[#allocation54_spill] sm:$0xff] %v3839_v58 }
 0x143   : > { %v889_v5 = vpop.f32.mrf.mxu2  ;;  %v677_v21 = vpop.f32.mrf.mxu1 }
 0x144   : > { %v966_v34 = vadd.f32 %v889_v5, %v675_v63  ;;  %v678_v56 = vadd.f32 %v677_v21, %v3623_v4  ;;  %v1210_v5 = vrot.slane %v3381_v0, 2  ;;  %v271_v21 = vld [vmem:[%s3289_s17 + $0x128] sm:$0xff] }
 0x146   : > { %v1120_v38 = vadd.f32 %v1043_v43, %v966_v34  ;;  %v1326_v14 = vpop.f32.mrf.mxu0  ;;  %2891 = vmatmul.msk.bf16.gmra.mxu1 %vm446_vm2, %v3447_v53 }
 0x148   : > { %2910 = vmatmul.msk.bf16.gmra.mxu2 %vm446_vm2, %v3795_v29  ;;  %v3849_v11 = vadd.f32 %v1323_v47, %v1120_v38  ;;  %v1053_v10 = vpop.f32.mrf.mxu3  ;;  %v1209_v47 = vrot.slane %v3432_v46, 1 }
 0x149   : > { %2948 = vmatmul.msk.bf16.gmra.mxu0 %vm446_vm2, %v1208_v35 }
 0x14a   : > { %4656 = vst [vmem:[#allocation55_spill] sm:$0xff] %v3849_v11  ;;  %v1211_v35 = vor.u32 %v1210_v5, %v1209_v47 }
 0x14b   : > { %v892_v43 = vpop.f32.mrf.mxu2  ;;  %v679_v3 = vpop.f32.mrf.mxu1 }
 0x14c   : > { %v967_v13 = vadd.f32 %v892_v43, %v678_v56  ;;  %v680_v34 = vadd.f32 %v679_v3, %v3635_v25 }
 0x14d   : > { %2931 = vmatmul.msk.bf16.gmra.mxu3 %vm446_vm2, %v3858_v26 }
 0x14e   : > { %v1121_v63 = vadd.f32 %v1046_v48, %v967_v13  ;;  %v1328_v29 = vpop.f32.mrf.mxu0  ;;  %v3869_v13 = vpack.c.bf16 %v271_v21, %v4658_v51 }
 0x150   : > { %v3862_v4 = vadd.f32 %v1326_v14, %v1121_v63  ;;  %v1056_v43 = vpop.f32.mrf.mxu3  ;;  %v1212_v14 = vsel %vm1149_vm4, %v1207_v54, %v1211_v35  ;;  %v999_v63 = vrot.slane %v3869_v13, 1 }
 0x152   : > { %4657 = vst [vmem:[#allocation56_spill] sm:$0xff] %v3862_v4  ;;  %v1000_v54 = vsel %vm763_vm3, %v3854_v2, %v999_v63 }
 0x153   : > { %v894_v38 = vpop.f32.mrf.mxu2  ;;  %v682_v56 = vpop.f32.mrf.mxu1 }
 0x154   : > { %v968_v48 = vadd.f32 %v894_v38, %v680_v34  ;;  %v683_v3 = vadd.f32 %v682_v56, %v3645_v44 }
 0x156   : > { %v1122_v11 = vadd.f32 %v1048_v8, %v968_v48  ;;  %v1331_v58 = vpop.f32.mrf.mxu0  ;;  %2892 = vmatmul.msk.bf16.gmra.mxu1 %vm446_vm2, %v3520_v45 }
 0x158   : > { %2911 = vmatmul.msk.bf16.gmra.mxu2 %vm446_vm2, %v3815_v49  ;;  %v3876_v25 = vadd.f32 %v1328_v29, %v1122_v11  ;;  %v1058_v34 = vpop.f32.mrf.mxu3  ;;  %v1213_v49 = vrot.slane %v3513_v39, 1  ;;  %v4660_v11 = vld [vmem:[#allocation22_spill] sm:$0xff] }
 0x159   : > { %2949 = vmatmul.msk.bf16.gmra.mxu0 %vm446_vm2, %v1212_v14  ;;  %v1214_v29 = vrot.slane %v4660_v11, 2  ;;  %v272_v14 = vld [vmem:[%s3289_s17 + $0x130] sm:$0xff] }
 0x15a   : > { %4659 = vst [vmem:[#allocation30_spill] sm:$0xff] %v3876_v25  ;;  %v3890_v25 = vpack.c.bf16 %v272_v14, %v272_v14 }
 0x15b   : > { %v897_v47 = vpop.f32.mrf.mxu2  ;;  %v684_v5 = vpop.f32.mrf.mxu1  ;;  %v1215_v51 = vor.u32 %v1214_v29, %v1213_v49  ;;  %v4603_v49 = vshll.u32 %v3869_v13, 16 }
 0x15c   : > { %v969_v8 = vadd.f32 %v897_v47, %v683_v3  ;;  %v685_v44 = vadd.f32 %v684_v5, %v3659_v33  ;;  %v1001_v5 = vrot.slane %v3890_v25, 1 }
 0x15d   : > { %2932 = vmatmul.msk.bf16.gmra.mxu3 %vm446_vm2, %v1000_v54  ;;  %v4602_v54 = vshrl.u32 %v3869_v13, 16 }
 0x15e   : > { %v1123_v21 = vadd.f32 %v1051_v16, %v969_v8  ;;  %v1333_v38 = vpop.f32.mrf.mxu0  ;;  %v1002_v14 = vsel %vm763_vm3, %v999_v63, %v1001_v5  ;;  %v1816_v63 = vrot.slane %v3482_v41, 2 }
 0x160   : > { %v3885_v48 = vadd.f32 %v1331_v58, %v1123_v21  ;;  %v1061_v16 = vpop.f32.mrf.mxu3  ;;  %v1216_v58 = vsel %vm1149_vm4, %v1211_v35, %v1215_v51 }
 0x163   : > { %v899_v56 = vpop.f32.mrf.mxu2  ;;  %v687_v47 = vpop.f32.mrf.mxu1 }
 0x164   : > { %v970_v3 = vadd.f32 %v899_v56, %v685_v44  ;;  %v688_v33 = vadd.f32 %v687_v47, %v3671_v20  ;;  %v1223_v20 = vrot.slane %v4603_v49, 2  ;;  %v1820_v49 = vrot.slane %v3485_v42, 3 }
 0x165   : > { %v1227_v42 = vshrl.u32 %v3890_v25, 16 }
 0x166   : > { %v1124_v8 = vadd.f32 %v1053_v10, %v970_v3  ;;  %v1336_v4 = vpop.f32.mrf.mxu0  ;;  %2893 = vmatmul.msk.bf16.gmra.mxu1 %vm446_vm2, %v3364_v57 }
 0x168   : > { %2912 = vmatmul.msk.bf16.gmra.mxu2 %vm446_vm2, %v3835_v32  ;;  %v3897_v21 = vadd.f32 %v1333_v38, %v1124_v8  ;;  %v1063_v56 = vpop.f32.mrf.mxu3  ;;  %v1220_v38 = vrot.slane %v4602_v54, 1  ;;  %v1819_v54 = vrot.slane %v3538_v7, 2 }
 0x169   : > { %2950 = vmatmul.msk.bf16.gmra.mxu0 %vm446_vm2, %v1216_v58 }
 0x16a   : > { %4661 = vst [vmem:[#allocation22_spill] sm:$0xff] %v3897_v21  ;;  %v1224_v58 = vor.u32 %v1223_v20, %v1220_v38 }
 0x16b   : > { %v902_v10 = vpop.f32.mrf.mxu2  ;;  %v689_v44 = vpop.f32.mrf.mxu1 }
 0x16c   : > { %v971_v29 = vadd.f32 %v902_v10, %v688_v33  ;;  %v690_v47 = vadd.f32 %v689_v44, %v3685_v24  ;;  %v1225_v24 = vsel %vm1149_vm4, %v1215_v51, %v1224_v58 }
 0x16d   : > { %2933 = vmatmul.msk.bf16.gmra.mxu3 %vm446_vm2, %v1002_v14  ;;  %v1230_v14 = vshll.u32 %v3890_v25, 16 }
 0x16e   : > { %v1125_v35 = vadd.f32 %v1056_v43, %v971_v29  ;;  %v1338_v32 = vpop.f32.mrf.mxu0  ;;  %v4662_v29 = vld [vmem:[#allocation21_spill] sm:$0xff] }
 0x16f   : > { %v1817_v21 = vrot.slane %v4662_v29, 3 }
 0x170   : > { %v3909_v3 = vadd.f32 %v1336_v4, %v1125_v35  ;;  %v1066_v43 = vpop.f32.mrf.mxu3  ;;  %v1821_v35 = vor.u32 %v1820_v49, %v1819_v54  ;;  %v4664_v54 = vld [vmem:[#allocation47_spill] sm:$0xff] }
 0x173   : > { %v904_v8 = vpop.f32.mrf.mxu2  ;;  %v692_v10 = vpop.f32.mrf.mxu1 }
 0x174   : > { %v972_v33 = vadd.f32 %v904_v8, %v690_v47  ;;  %v693_v41 = vadd.f32 %v692_v10, %v3697_v12  ;;  %v1229_v8 = vrot.slane %v1227_v42, 1  ;;  %v4663_v10 = vld [vmem:[#allocation32_spill] sm:$0xff] }
 0x176   : > { %v1126_v5 = vadd.f32 %v1058_v34, %v972_v33  ;;  %v1341_v4 = vpop.f32.mrf.mxu0  ;;  %2894 = vmatmul.msk.bf16.gmra.mxu1 %vm446_vm2, %v3369_v60  ;;  %v1818_v34 = vor.u32 %v1817_v21, %v1816_v63  ;;  %v1232_v33 = vrot.slane %v1230_v14, 2  ;;  %v799_v21 = vrot.slane %v4663_v10, 1  ;;  %v4666_v14 = vld [vmem:[#allocation31_spill] sm:$0xff] }
 0x178   : > { %2913 = vmatmul.msk.bf16.gmra.mxu2 %vm446_vm2, %v3858_v26  ;;  %v3922_v44 = vadd.f32 %v1338_v32, %v1126_v5  ;;  %v1068_v51 = vpop.f32.mrf.mxu3  ;;  %v1822_v26 = vsel %vm1815_vm5, %v1818_v34, %v1821_v35  ;;  %v1233_v5 = vor.u32 %v1232_v33, %v1229_v8 }
 0x179   : > { %2951 = vmatmul.msk.bf16.gmra.mxu0 %vm446_vm2, %v1225_v24 }
 0x17b   : > { %v907_v7 = vpop.f32.mrf.mxu2  ;;  %v694_v20 = vpop.f32.mrf.mxu1 }
 0x17c   : > { %v973_v38 = vadd.f32 %v907_v7, %v693_v41  ;;  %v695_v49 = vadd.f32 %v694_v20, %v4664_v54  ;;  %v4665_v7 = vld [vmem:[#allocation33_spill] sm:$0xff] }
 0x17d   : > { %2992 = vmatmul.msk.bf16.vlgmr.msra.gmra.mxu3 %vm446_vm2, %v1822_v26  ;;  %v1823_v42 = vrot.slane %v4665_v7, 2  ;;  %v4667_v26 = vld [vmem:[#allocation50_spill] sm:$0xff] }
 0x17e   : > { %v1127_v47 = vadd.f32 %v1061_v16, %v973_v38  ;;  %v1343_v32 = vpop.f32.mrf.mxu0  ;;  %v800_v16 = vsel %vm763_vm3, %v3854_v2, %v799_v21  ;;  %v4671_v7 = vld [vmem:[#allocation26_spill] sm:$0xff] }
 0x180   : > { %v3929_v12 = vadd.f32 %v1341_v4, %v1127_v47  ;;  %v1071_v41 = vpop.f32.mrf.mxu3  ;;  %v1824_v4 = vrot.slane %v4666_v14, 3  ;;  %v1234_v47 = vsel %vm1149_vm4, %v1224_v58, %v1233_v5  ;;  %v2437_v58 = vld [vmem:[%s4561_s3] sm:$0xff] }
 0x181   : > { %v4668_v5 = vld [vmem:[#allocation15_spill] sm:$0xff] }
 0x182   : > { %v1825_v2 = vor.u32 %v1824_v4, %v1823_v42  ;;  %v1433_v42 = vrot.slane %v4671_v7, 2 }
 0x183   : > { %v909_v63 = vpop.f32.mrf.mxu2  ;;  %v697_v24 = vpop.f32.mrf.mxu1 }
 0x184   : > { %v974_v29 = vadd.f32 %v909_v63, %v695_v49  ;;  %v698_v8 = vadd.f32 %v697_v24, %v4667_v26  ;;  %v1826_v49 = vsel %vm1815_vm5, %v1821_v35, %v1825_v2  ;;  %v3187_v24 = vmov 0  }
 0x185   : > { %3085 = vset.pattern.permute.xlu0 %v3187_v24  ;;  %3086 = vset.pattern.permute.xlu1 %v3187_v24 }
 0x186   : > { %v1128_v34 = vadd.f32 %v1063_v56, %v974_v29  ;;  %v1346_v38 = vpop.f32.mrf.mxu0  ;;  %2895 = vmatmul.msk.bf16.gmra.mxu1 %vm446_vm2, %v3418_v36  ;;  %v4669_v29 = vld [vmem:[#allocation17_spill] sm:$0xff]  ;;  %2475 = vperm.xlu0 %3085, %v2437_v58   ;;  %v4674_v58 = vld [vmem:[#allocation10_spill] sm:$0xff] }
 0x187   : > { %3087 = vset.pattern.permute.xlu2 %v3187_v24  ;;  %v2096_v4 = vrot.slane %v4669_v29, 3 }
 0x188   : > { %2914 = vmatmul.msk.bf16.gmra.mxu2 %vm446_vm2, %v800_v16  ;;  %v3942_v20 = vadd.f32 %v1343_v32, %v1128_v34  ;;  %v1073_v21 = vpop.f32.mrf.mxu3  ;;  %v1430_v32 = vrot.slane %v4668_v5, 2  ;;  %v1431_v16 = vrot.slane %v4669_v29, 2  ;;  %v4673_v5 = vld [vmem:[#allocation11_spill] sm:$0xff] }
 0x189   : > { %2952 = vmatmul.msk.bf16.gmra.mxu0 %vm446_vm2, %v1234_v47  ;;  %v2097_v47 = vrot.slane %v4671_v7, 3  ;;  %v4676_v7 = vld [vmem:[#allocation35_spill] sm:$0xff] }
 0x18b   : > { %v912_v56 = vpop.f32.mrf.mxu2  ;;  %v699_v10 = vpop.f32.mrf.mxu1  ;;  %v2098_v29 = vsel %vm2095_vm7, %v2096_v4, %v2097_v47 }
 0x18c   : > { %v975_v33 = vadd.f32 %v912_v56, %v698_v8  ;;  %v1432_v56 = vsel %vm1429_vm6, %v1430_v32, %v1431_v16 }
 0x18d   : > { %2993 = vmatmul.msk.bf16.gmra.mxu3 %vm446_vm2, %v1826_v49  ;;  %v1827_v49 = vrot.slane %v4673_v5, 2 }
 0x18e   : > { %v1129_v54 = vadd.f32 %v1066_v43, %v975_v33  ;;  %v1348_v63 = vpop.f32.mrf.mxu0  ;;  %v4672_v43 = vld [vmem:[#allocation52_spill] sm:$0xff]  ;;  %v1434_v33 = vsel %vm1429_vm6, %v1431_v16, %v1433_v42 }
 0x18f   : > { %v700_v35 = vadd.f32 %v699_v10, %v4672_v43 }
 0x190   : > { %v3952_v34 = vadd.f32 %v1346_v38, %v1129_v54  ;;  %v1076_v38 = vpop.f32.mrf.mxu3 }
 0x192   : > { %4670 = vst [vmem:[#allocation21_spill] sm:$0xff] %v3952_v34  ;;  %v1828_v34 = vrot.slane %v4674_v58, 3 }
 0x193   : > { %v914_v14 = vpop.f32.mrf.mxu2  ;;  %v702_v8 = vpop.f32.mrf.mxu1 }
 0x194   : > { %v976_v26 = vadd.f32 %v914_v14, %v700_v35  ;;  %v703_v32 = vadd.f32 %v702_v8, %v4676_v7  ;;  %v1829_v43 = vor.u32 %v1828_v34, %v1827_v49  ;;  %v4678_v34 = vld [vmem:[#allocation29_spill] sm:$0xff]  ;;  %v4679_v49 = vld [vmem:[#allocation36_spill] sm:$0xff] }
 0x195   : > { %v2099_v7 = vrot.slane %v4678_v34, 3 }
 0x196   : > { %v1130_v54 = vadd.f32 %v1068_v51, %v976_v26  ;;  %v1351_v10 = vpop.f32.mrf.mxu0  ;;  %2954 = vmatmul.msk.bf16.vlgmr.msra.gmra.mxu1 %vm446_vm2, %v1432_v56  ;;  %v2438_v51 = vld [vmem:[%s4561_s3 + $0x8] sm:$0xff]  ;;  %v1830_v4 = vsel %vm1815_vm5, %v1825_v2, %v1829_v43 }
 0x197   : > { %2480 = vperm.xlu0 %3085, %v2438_v51  }
 0x198   : > { %2973 = vmatmul.msk.bf16.vlgmr.msra.gmra.mxu2 %vm446_vm2, %v1434_v33  ;;  %v3966_v24 = vadd.f32 %v1348_v63, %v1130_v54  ;;  %v1078_v26 = vpop.f32.mrf.mxu3  ;;  %v2439_v63 = vld [vmem:[%s4561_s3 + $0x10] sm:$0xff]  ;;  %v1435_v54 = vrot.slane %v4678_v34, 2 }
 0x199   : > { %3011 = vmatmul.msk.bf16.vlgmr.msra.gmra.mxu0 %vm446_vm2, %v2098_v29  ;;  %2485 = vperm.xlu1 %3086, %v2439_v63   ;;  %v4681_v63 = vld [vmem:[#allocation12_spill] sm:$0xff]  ;;  %v4683_v34 = vld [vmem:[#allocation38_spill] sm:$0xff] }
 0x19a   : > { %4675 = vst [vmem:[#allocation32_spill] sm:$0xff] %v3966_v24  ;;  %v1436_v51 = vsel %vm1429_vm6, %v1433_v42, %v1435_v54 }
 0x19b   : > { %v917_v16 = vpop.f32.mrf.mxu2  ;;  %v704_v14 = vpop.f32.mrf.mxu1 }
 0x19c   : > { %v977_v35 = vadd.f32 %v917_v16, %v703_v32  ;;  %v705_v58 = vadd.f32 %v704_v14, %v4679_v49 }
 0x19d   : > { %2994 = vmatmul.msk.bf16.gmra.mxu3 %vm446_vm2, %v1830_v4  ;;  %v2100_v4 = vsel %vm2095_vm7, %v2097_v47, %v2099_v7 }
 0x19e   : > { %v1131_v56 = vadd.f32 %v1071_v41, %v977_v35  ;;  %v1353_v5 = vpop.f32.mrf.mxu0  ;;  %v4680_v35 = vld [vmem:[#allocation18_spill] sm:$0xff] }
 0x19f   : > { %v1831_v24 = vrot.slane %v4680_v35, 2 }
 0x1a0   : > { %v3977_v8 = vadd.f32 %v1351_v10, %v1131_v56  ;;  %v1081_v2 = vpop.f32.mrf.mxu3  ;;  %v1832_v10 = vrot.slane %v4681_v63, 3 }
 0x1a2   : > { %4677 = vst [vmem:[#allocation47_spill] sm:$0xff] %v3977_v8  ;;  %v4688_v8 = vld [vmem:[#allocation19_spill] sm:$0xff] }
 0x1a3   : > { %v919_v29 = vpop.f32.mrf.mxu2  ;;  %v707_v32 = vpop.f32.mrf.mxu1 }
 0x1a4   : > { %v978_v41 = vadd.f32 %v919_v29, %v705_v58  ;;  %v708_v49 = vadd.f32 %v707_v32, %v4683_v34  ;;  %v1833_v58 = vor.u32 %v1832_v10, %v1831_v24  ;;  %v4686_v24 = vld [vmem:[#allocation40_spill] sm:$0xff] }
 0x1a6   : > { %v1132_v16 = vadd.f32 %v1073_v21, %v978_v41  ;;  %v1356_v56 = vpop.f32.mrf.mxu0  ;;  %2955 = vmatmul.msk.bf16.gmra.mxu1 %vm446_vm2, %v1434_v33  ;;  %v2440_v21 = vld [vmem:[%s4561_s3 + $0x18] sm:$0xff]  ;;  %v1834_v47 = vsel %vm1815_vm5, %v1829_v43, %v1833_v58 }
 0x1a7   : > { %2490 = vperm.xlu1 %3086, %v2440_v21  }
 0x1a8   : > { %2974 = vmatmul.msk.bf16.gmra.mxu2 %vm446_vm2, %v1436_v51  ;;  %v3989_v14 = vadd.f32 %v1353_v5, %v1132_v16  ;;  %v1083_v33 = vpop.f32.mrf.mxu3  ;;  %v4685_v16 = vld [vmem:[#allocation8_spill] sm:$0xff] }
 0x1a9   : > { %3012 = vmatmul.msk.bf16.gmra.mxu0 %vm446_vm2, %v2100_v4  ;;  %v1437_v32 = vrot.slane %v4685_v16, 2  ;;  %v2101_v34 = vrot.slane %v4685_v16, 3  ;;  %v4690_v16 = vld [vmem:[#allocation42_spill] sm:$0xff] }
 0x1aa   : > { %4682 = vst [vmem:[#allocation33_spill] sm:$0xff] %v3989_v14 }
 0x1ab   : > { %v922_v42 = vpop.f32.mrf.mxu2  ;;  %v709_v41 = vpop.f32.mrf.mxu1 }
 0x1ac   : > { %v979_v29 = vadd.f32 %v922_v42, %v708_v49  ;;  %v710_v10 = vadd.f32 %v709_v41, %v4686_v24  ;;  %v1438_v42 = vsel %vm1429_vm6, %v1435_v54, %v1437_v32 }
 0x1ad   : > { %2995 = vmatmul.msk.bf16.gmra.mxu3 %vm446_vm2, %v1834_v47  ;;  %v2102_v47 = vsel %vm2095_vm7, %v2099_v7, %v2101_v34  ;;  %v2443_v7 = vld [vmem:[%s4561_s3 + $0x30] sm:$0xff] }
 0x1ae   : > { %v1133_v35 = vadd.f32 %v1076_v38, %v979_v29  ;;  %v1358_v63 = vpop.f32.mrf.mxu0  ;;  %v4687_v29 = vld [vmem:[#allocation27_spill] sm:$0xff]  ;;  %2505 = vperm.xlu0 %3085, %v2443_v7   ;;  %v4695_v7 = vld [vmem:[#allocation28_spill] sm:$0xff] }
 0x1af   : > { %v1835_v43 = vrot.slane %v4687_v29, 2 }
 0x1b0   : > { %v3997_v5 = vadd.f32 %v1356_v56, %v1133_v35  ;;  %v1086_v49 = vpop.f32.mrf.mxu3  ;;  %v1836_v56 = vrot.slane %v4688_v8, 3 }
 0x1b2   : > { %4684 = vst [vmem:[#allocation31_spill] sm:$0xff] %v3997_v5 }
 0x1b3   : > { %v924_v4 = vpop.f32.mrf.mxu2  ;;  %v712_v21 = vpop.f32.mrf.mxu1 }
 0x1b4   : > { %v980_v14 = vadd.f32 %v924_v4, %v710_v10  ;;  %v713_v24 = vadd.f32 %v712_v21, %v4690_v16  ;;  %v1837_v10 = vor.u32 %v1836_v56, %v1835_v43 }
 0x1b6   : > { %v1134_v38 = vadd.f32 %v1078_v26, %v980_v14  ;;  %v1361_v35 = vpop.f32.mrf.mxu0  ;;  %2956 = vmatmul.msk.bf16.gmra.mxu1 %vm446_vm2, %v1436_v51  ;;  %v1838_v8 = vsel %vm1815_vm5, %v1833_v58, %v1837_v10 }
 0x1b8   : > { %2975 = vmatmul.msk.bf16.gmra.mxu2 %vm446_vm2, %v1438_v42  ;;  %v4009_v41 = vadd.f32 %v1358_v63, %v1134_v38  ;;  %v1088_v4 = vpop.f32.mrf.mxu3  ;;  %v4692_v63 = vld [vmem:[#allocation9_spill] sm:$0xff]  ;;  %v4693_v38 = vld [vmem:[#allocation44_spill] sm:$0xff] }
 0x1b9   : > { %3013 = vmatmul.msk.bf16.gmra.mxu0 %vm446_vm2, %v2102_v47  ;;  %v1439_v21 = vrot.slane %v4692_v63, 2  ;;  %v2103_v47 = vrot.slane %v4692_v63, 3  ;;  %v4697_v63 = vld [vmem:[#allocation46_spill] sm:$0xff] }
 0x1ba   : > { %4689 = vst [vmem:[#allocation50_spill] sm:$0xff] %v4009_v41 }
 0x1bb   : > { %v927_v54 = vpop.f32.mrf.mxu2  ;;  %v714_v14 = vpop.f32.mrf.mxu1 }
 0x1bc   : > { %v981_v26 = vadd.f32 %v927_v54, %v713_v24  ;;  %v715_v43 = vadd.f32 %v714_v14, %v4693_v38  ;;  %v1440_v24 = vsel %vm1429_vm6, %v1437_v32, %v1439_v21  ;;  %v2444_v32 = vld [vmem:[%s4561_s3 + $0x38] sm:$0xff] }
 0x1bd   : > { %2996 = vmatmul.msk.bf16.gmra.mxu3 %vm446_vm2, %v1838_v8  ;;  %v2104_v8 = vsel %vm2095_vm7, %v2101_v34, %v2103_v47  ;;  %2510 = vperm.xlu1 %3086, %v2444_v32  }
 0x1be   : > { %v1135_v29 = vadd.f32 %v1081_v2, %v981_v26  ;;  %v1363_v5 = vpop.f32.mrf.mxu0  ;;  %v4694_v26 = vld [vmem:[#allocation34_spill] sm:$0xff] }
 0x1bf   : > { %v1839_v41 = vrot.slane %v4694_v26, 2 }
 0x1c0   : > { %v4017_v51 = vadd.f32 %v1361_v35, %v1135_v29  ;;  %v1091_v58 = vpop.f32.mrf.mxu3  ;;  %v1840_v35 = vrot.slane %v4695_v7, 3  ;;  %v4699_v7 = vld [vmem:[#allocation16_spill] sm:$0xff] }
 0x1c2   : > { %4691 = vst [vmem:[#allocation15_spill] sm:$0xff] %v4017_v51 }
 0x1c3   : > { %v929_v56 = vpop.f32.mrf.mxu2  ;;  %v717_v16 = vpop.f32.mrf.mxu1 }
 0x1c4   : > { %v982_v2 = vadd.f32 %v929_v56, %v715_v43  ;;  %v718_v38 = vadd.f32 %v717_v16, %v4697_v63  ;;  %v1841_v43 = vor.u32 %v1840_v35, %v1839_v41  ;;  %v2442_v41 = vld [vmem:[%s4561_s3 + $0x28] sm:$0xff]  ;;  %v1441_v35 = vrot.slane %v4699_v7, 2 }
 0x1c6   : > { %v1136_v54 = vadd.f32 %v1083_v33, %v982_v2  ;;  %v1366_v29 = vpop.f32.mrf.mxu0  ;;  %2957 = vmatmul.msk.bf16.gmra.mxu1 %vm446_vm2, %v1438_v42  ;;  %v2441_v33 = vld [vmem:[%s4561_s3 + $0x20] sm:$0xff]  ;;  %v1842_v16 = vsel %vm1815_vm5, %v1837_v10, %v1841_v43 }
 0x1c7   : > { %2495 = vperm.xlu2 %3087, %v2441_v33  }
 0x1c8   : > { %2976 = vmatmul.msk.bf16.gmra.mxu2 %vm446_vm2, %v1440_v24  ;;  %v4029_v14 = vadd.f32 %v1363_v5, %v1136_v54  ;;  %v1093_v5 = vpop.f32.mrf.mxu3 }
 0x1c9   : > { %3014 = vmatmul.msk.bf16.gmra.mxu0 %vm446_vm2, %v2104_v8  ;;  %v4700_v8 = vld [vmem:[#allocation49_spill] sm:$0xff] }
 0x1ca   : > { %4696 = vst [vmem:[#allocation17_spill] sm:$0xff] %v4029_v14  ;;  %v4701_v14 = vld [vmem:[#allocation25_spill] sm:$0xff] }
 0x1cb   : > { %v932_v42 = vpop.f32.mrf.mxu2  ;;  %v719_v56 = vpop.f32.mrf.mxu1  ;;  %v1843_v51 = vrot.slane %v4701_v14, 2 }
 0x1cc   : > { %v983_v34 = vadd.f32 %v932_v42, %v718_v38  ;;  %v720_v63 = vadd.f32 %v719_v56, %v4700_v8  ;;  %v2105_v38 = vrot.slane %v4699_v7, 3  ;;  %v1442_v42 = vsel %vm1429_vm6, %v1439_v21, %v1441_v35 }
 0x1cd   : > { %2997 = vmatmul.msk.bf16.gmra.mxu3 %vm446_vm2, %v1842_v16 }
 0x1ce   : > { %v1137_v2 = vadd.f32 %v1086_v49, %v983_v34  ;;  %v1368_v54 = vpop.f32.mrf.mxu0  ;;  %v2106_v16 = vsel %vm2095_vm7, %v2103_v47, %v2105_v38 }
 0x1cf   : > { %2500 = vperm.xlu2 %3087, %v2442_v41   ;;  %v4704_v41 = vld [vmem:[#allocation51_spill] sm:$0xff] }
 0x1d0   : > { %v4043_v26 = vadd.f32 %v1366_v29, %v1137_v2  ;;  %v1096_v10 = vpop.f32.mrf.mxu3  ;;  %v4702_v29 = vld [vmem:[#allocation23_spill] sm:$0xff] }
 0x1d1   : > { %v1844_v2 = vrot.slane %v4702_v29, 3  ;;  %v4706_v29 = vld [vmem:[#allocation53_spill] sm:$0xff] }
 0x1d2   : > { %4698 = vst [vmem:[#allocation26_spill] sm:$0xff] %v4043_v26 }
 0x1d3   : > { %v934_v33 = vpop.f32.mrf.mxu2  ;;  %v722_v32 = vpop.f32.mrf.mxu1  ;;  %v1845_v8 = vor.u32 %v1844_v2, %v1843_v51  ;;  %v4705_v51 = vld [vmem:[#allocation24_spill] sm:$0xff] }
 0x1d4   : > { %v984_v49 = vadd.f32 %v934_v33, %v720_v63  ;;  %v723_v7 = vadd.f32 %v722_v32, %v4704_v41  ;;  %v2107_v41 = vrot.slane %v4705_v51, 3 }
 0x1d5   : > { %v1846_v47 = vsel %vm1815_vm5, %v1841_v43, %v1845_v8 }
 0x1d6   : > { %v1138_v34 = vadd.f32 %v1088_v4, %v984_v49  ;;  %v1371_v26 = vpop.f32.mrf.mxu0  ;;  %2958 = vmatmul.msk.bf16.gmra.mxu1 %vm446_vm2, %v1440_v24  ;;  %v2446_v4 = vld [vmem:[%s4561_s3 + $0x48] sm:$0xff] }
 0x1d7   : > { %2520 = vperm.xlu0 %3085, %v2446_v4  }
 0x1d8   : > { %2977 = vmatmul.msk.bf16.gmra.mxu2 %vm446_vm2, %v1442_v42  ;;  %v4055_v56 = vadd.f32 %v1368_v54, %v1138_v34  ;;  %v1098_v24 = vpop.f32.mrf.mxu3  ;;  %v2447_v54 = vld [vmem:[%s4561_s3 + $0x50] sm:$0xff]  ;;  %v1443_v34 = vrot.slane %v4705_v51, 2 }
 0x1d9   : > { %3015 = vmatmul.msk.bf16.gmra.mxu0 %vm446_vm2, %v2106_v16  ;;  %2525 = vperm.xlu1 %3086, %v2447_v54   ;;  %v4708_v54 = vld [vmem:[#allocation13_spill] sm:$0xff] }
 0x1da   : > { %4703 = vst [vmem:[#allocation52_spill] sm:$0xff] %v4055_v56  ;;  %v1444_v4 = vsel %vm1429_vm6, %v1441_v35, %v1443_v34  ;;  %v4710_v51 = vld [vmem:[#allocation37_spill] sm:$0xff] }
 0x1db   : > { %v937_v21 = vpop.f32.mrf.mxu2  ;;  %v724_v63 = vpop.f32.mrf.mxu1 }
 0x1dc   : > { %v985_v14 = vadd.f32 %v937_v21, %v723_v7  ;;  %v725_v2 = vadd.f32 %v724_v63, %v4706_v29 }
 0x1dd   : > { %2998 = vmatmul.msk.bf16.gmra.mxu3 %vm446_vm2, %v1846_v47  ;;  %v2108_v47 = vsel %vm2095_vm7, %v2105_v38, %v2107_v41 }
 0x1de   : > { %v1139_v33 = vadd.f32 %v1091_v58, %v985_v14  ;;  %v1373_v49 = vpop.f32.mrf.mxu0  ;;  %v4707_v14 = vld [vmem:[#allocation14_spill] sm:$0xff] }
 0x1df   : > { %v1847_v56 = vrot.slane %v4707_v14, 2 }
 0x1e0   : > { %v4066_v32 = vadd.f32 %v1371_v26, %v1139_v33  ;;  %v1101_v43 = vpop.f32.mrf.mxu3  ;;  %v1848_v26 = vrot.slane %v4708_v54, 3 }
 0x1e3   : > { %v939_v16 = vpop.f32.mrf.mxu2  ;;  %v727_v7 = vpop.f32.mrf.mxu1 }
 0x1e4   : > { %v986_v58 = vadd.f32 %v939_v16, %v725_v2  ;;  %v728_v29 = vadd.f32 %v727_v7, %v4710_v51  ;;  %v1849_v2 = vor.u32 %v1848_v26, %v1847_v56  ;;  %v1445_v56 = vrot.slane %v3420_v37, 2 }
 0x1e5   : > { %v2109_v51 = vrot.slane %v3420_v37, 3  ;;  %v4713_v37 = vld [vmem:[#allocation41_spill] sm:$0xff] }
 0x1e6   : > { %v1140_v21 = vadd.f32 %v1093_v5, %v986_v58  ;;  %v1376_v33 = vpop.f32.mrf.mxu0  ;;  %2959 = vmatmul.msk.bf16.gmra.mxu1 %vm446_vm2, %v1442_v42  ;;  %v2445_v5 = vld [vmem:[%s4561_s3 + $0x40] sm:$0xff]  ;;  %v1850_v38 = vsel %vm1815_vm5, %v1845_v8, %v1849_v2 }
 0x1e7   : > { %2515 = vperm.xlu2 %3087, %v2445_v5   ;;  %v1446_v5 = vsel %vm1429_vm6, %v1443_v34, %v1445_v56 }
 0x1e8   : > { %2978 = vmatmul.msk.bf16.gmra.mxu2 %vm446_vm2, %v1444_v4  ;;  %v4078_v63 = vadd.f32 %v1373_v49, %v1140_v21  ;;  %v1103_v42 = vpop.f32.mrf.mxu3  ;;  %v2449_v49 = vld [vmem:[%s4561_s3 + $0x60] sm:$0xff] }
 0x1e9   : > { %3016 = vmatmul.msk.bf16.gmra.mxu0 %vm446_vm2, %v2108_v47  ;;  %2535 = vperm.xlu0 %3085, %v2449_v49   ;;  %v4711_v21 = vld [vmem:[#allocation39_spill] sm:$0xff] }
 0x1ea   : > { %4709 = vst [vmem:[#allocation11_spill] sm:$0xff] %v4078_v63 }
 0x1eb   : > { %v942_v35 = vpop.f32.mrf.mxu2  ;;  %v729_v58 = vpop.f32.mrf.mxu1 }
 0x1ec   : > { %v987_v16 = vadd.f32 %v942_v35, %v728_v29  ;;  %v730_v26 = vadd.f32 %v729_v58, %v4711_v21 }
 0x1ed   : > { %2999 = vmatmul.msk.bf16.gmra.mxu3 %vm446_vm2, %v1850_v38  ;;  %v2110_v38 = vsel %vm2095_vm7, %v2107_v41, %v2109_v51 }
 0x1ee   : > { %v1141_v14 = vadd.f32 %v1096_v10, %v987_v16  ;;  %v1378_v54 = vpop.f32.mrf.mxu0  ;;  %v4712_v16 = vld [vmem:[#allocation20_spill] sm:$0xff] }
 0x1ef   : > { %v1851_v63 = vrot.slane %v4712_v16, 2 }
 0x1f0   : > { %v4089_v7 = vadd.f32 %v1376_v33, %v1141_v14  ;;  %v1106_v8 = vpop.f32.mrf.mxu3  ;;  %v1852_v33 = vrot.slane %v3330_v31, 3 }
 0x1f2   : > { %v1853_v21 = vor.u32 %v1852_v33, %v1851_v63  ;;  %v1447_v63 = vrot.slane %v3303_v18, 2 }
 0x1f3   : > { %v944_v47 = vpop.f32.mrf.mxu2  ;;  %v732_v29 = vpop.f32.mrf.mxu1 }
 0x1f4   : > { %v988_v10 = vadd.f32 %v944_v47, %v730_v26  ;;  %v733_v49 = vadd.f32 %v732_v29, %v4713_v37  ;;  %v1854_v41 = vsel %vm1815_vm5, %v1849_v2, %v1853_v21 }
 0x1f6   : > { %v1142_v35 = vadd.f32 %v1098_v24, %v988_v10  ;;  %v1381_v14 = vpop.f32.mrf.mxu0  ;;  %2960 = vmatmul.msk.bf16.gmra.mxu1 %vm446_vm2, %v1444_v4  ;;  %v2450_v24 = vld [vmem:[%s4561_s3 + $0x68] sm:$0xff] }
 0x1f7   : > { %2540 = vperm.xlu1 %3086, %v2450_v24  }
 0x1f8   : > { %2979 = vmatmul.msk.bf16.gmra.mxu2 %vm446_vm2, %v1446_v5  ;;  %v4101_v58 = vadd.f32 %v1378_v54, %v1142_v35  ;;  %v1108_v4 = vpop.f32.mrf.mxu3  ;;  %v2448_v54 = vld [vmem:[%s4561_s3 + $0x58] sm:$0xff] }
 0x1f9   : > { %3017 = vmatmul.msk.bf16.gmra.mxu0 %vm446_vm2, %v2110_v38  ;;  %2530 = vperm.xlu2 %3087, %v2448_v54   ;;  %v4714_v35 = vld [vmem:[#allocation43_spill] sm:$0xff]  ;;  %v2111_v38 = vrot.slane %v3303_v18, 3  ;;  %v4715_v18 = vld [vmem:[#allocation45_spill] sm:$0xff] }
 0x1fb   : > { %v947_v34 = vpop.f32.mrf.mxu2  ;;  %v734_v26 = vpop.f32.mrf.mxu1 }
 0x1fc   : > { %v989_v31 = vadd.f32 %v947_v34, %v733_v49  ;;  %v735_v16 = vadd.f32 %v734_v26, %v4714_v35  ;;  %v1448_v49 = vsel %vm1429_vm6, %v1445_v56, %v1447_v63  ;;  %v1855_v34 = vrot.slane %v3468_v17, 2  ;;  %v2452_v17 = vld [vmem:[%s4561_s3 + $0x78] sm:$0xff] }
 0x1fd   : > { %3000 = vmatmul.msk.bf16.gmra.mxu3 %vm446_vm2, %v1854_v41  ;;  %2550 = vperm.xlu0 %3085, %v2452_v17   ;;  %v1860_v17 = vrot.slane %v3471_v19, 3 }
 0x1fe   : > { %v1143_v47 = vadd.f32 %v1101_v43, %v989_v31  ;;  %v1383_v10 = vpop.f32.mrf.mxu0 }
 0x200   : > { %v4112_v29 = vadd.f32 %v1381_v14, %v1143_v47  ;;  %v1967_v2 = vpop.f32.mrf.mxu3  ;;  %v1856_v14 = vrot.slane %v3397_v6, 3  ;;  %v2112_v47 = vsel %vm2095_vm7, %v2109_v51, %v2111_v38 }
 0x202   : > { %v1857_v54 = vor.u32 %v1856_v14, %v1855_v34  ;;  %v2113_v14 = vrot.slane %v3312_v22, 3 }
 0x203   : > { %v949_v33 = vpop.f32.mrf.mxu2  ;;  %v737_v37 = vpop.f32.mrf.mxu1 }
 0x204   : > { %v990_v43 = vadd.f32 %v949_v33, %v735_v16  ;;  %v738_v41 = vadd.f32 %v737_v37, %v4715_v18  ;;  %v1858_v51 = vsel %vm1815_vm5, %v1853_v21, %v1857_v54  ;;  %v4716_v37 = vld [vmem:[#allocation48_spill] sm:$0xff] }
 0x206   : > { %v1144_v24 = vadd.f32 %v1103_v42, %v990_v43  ;;  %v1386_v31 = vpop.f32.mrf.mxu0  ;;  %2961 = vmatmul.msk.bf16.gmra.mxu1 %vm446_vm2, %v1446_v5  ;;  %v1449_v43 = vrot.slane %v3312_v22, 2 }
 0x208   : > { %2980 = vmatmul.msk.bf16.gmra.mxu2 %vm446_vm2, %v1448_v49  ;;  %v4124_v26 = vadd.f32 %v1383_v10, %v1144_v24  ;;  %v1969_v5 = vpop.f32.mrf.mxu3  ;;  %v2453_v10 = vld [vmem:[%s4561_s3 + $0x80] sm:$0xff]  ;;  %v1450_v18 = vsel %vm1429_vm6, %v1447_v63, %v1449_v43 }
 0x209   : > { %3018 = vmatmul.msk.bf16.gmra.mxu0 %vm446_vm2, %v2112_v47  ;;  %2555 = vperm.xlu1 %3086, %v2453_v10  }
 0x20b   : > { %v952_v42 = vpop.f32.mrf.mxu2  ;;  %v739_v56 = vpop.f32.mrf.mxu1 }
 0x20c   : > { %v991_v6 = vadd.f32 %v952_v42, %v738_v41  ;;  %v740_v24 = vadd.f32 %v739_v56, %v4716_v37  ;;  %v2455_v37 = vld [vmem:[%s4561_s3 + $0x90] sm:$0xff] }
 0x20d   : > { %3001 = vmatmul.msk.bf16.gmra.mxu3 %vm446_vm2, %v1858_v51  ;;  %2565 = vperm.xlu0 %3085, %v2455_v37  }
 0x20e   : > { %v1145_v35 = vadd.f32 %v1106_v8, %v991_v6  ;;  %v1388_v16 = vpop.f32.mrf.mxu0  ;;  %v2114_v6 = vsel %vm2095_vm7, %v2111_v38, %v2113_v14 }
 0x210   : > { %v4135_v33 = vadd.f32 %v1386_v31, %v1145_v35  ;;  %v4141_v21 = vpop.f32.mrf.mxu3  ;;  %v1859_v31 = vrot.slane %v3531_v52, 2  ;;  %v2451_v52 = vld [vmem:[%s4561_s3 + $0x70] sm:$0xff] }
 0x211   : > { %2545 = vperm.xlu2 %3087, %v2451_v52   ;;  %v1863_v52 = vrot.slane %v3570_v40, 2 }
 0x212   : > { %v1861_v63 = vor.u32 %v1860_v17, %v1859_v31 }
 0x213   : > { %v954_v34 = vpop.f32.mrf.mxu2  ;;  %v1533_v47 = vpop.f32.mrf.mxu1 }
 0x214   : > { %v992_v8 = vadd.f32 %v954_v34, %v740_v24  ;;  %v1623_v56 = vadd.f32 %v1533_v47, %v3760_v1  ;;  %v4164_v1 = vld [vmem:[%s4560_s2] ss:$0 sm:$0xff]  ;;  %v1862_v51 = vsel %vm1815_vm5, %v1857_v54, %v1861_v63  ;;  %v2476_v24 = vpop.permute.xlu0 %2475  ;;  %v1451_v34 = vrot.slane %v3367_v59, 2 }
 0x215   : > { %v2115_v54 = vrot.slane %v3367_v59, 3 }
 0x216   : > { %v1146_v41 = vadd.f32 %v1108_v4, %v992_v8  ;;  %v2199_v42 = vpop.f32.mrf.mxu0  ;;  %2962 = vmatmul.msk.bf16.gmra.mxu1 %vm446_vm2, %v1448_v49 }
 0x218   : > { %2981 = vmatmul.msk.bf16.gmra.mxu2 %vm446_vm2, %v1450_v18  ;;  %v4149_v22 = vadd.f32 %v1388_v16, %v1146_v41  ;;  %v4159_v38 = vpop.f32.mrf.mxu3 }
 0x219   : > { %3019 = vmatmul.msk.bf16.gmra.mxu0 %vm446_vm2, %v2114_v6  ;;  %v1452_v6 = vsel %vm1429_vm6, %v1449_v43, %v1451_v34 }
 0x21b   : > { %v1687_v4 = vpop.f32.mrf.mxu2  ;;  %v1535_v35 = vpop.f32.mrf.mxu1 }
 0x21c   : > { %v1777_v19 = vadd.f32 %v1687_v4, %v1623_v56 }
 0x21d   : > { %3002 = vmatmul.msk.bf16.gmra.mxu3 %vm446_vm2, %v1862_v51 }
 0x21e   : > { %v2057_v49 = vadd.f32 %v1967_v2, %v1777_v19  ;;  %v2201_v16 = vpop.f32.mrf.mxu0  ;;  %v1624_v2 = vadd.f32 %v1535_v35, %v3769_v15  ;;  %v1864_v15 = vrot.slane %v3534_v23, 3  ;;  %v2116_v19 = vsel %vm2095_vm7, %v2113_v14, %v2115_v54 }
 0x220   : > { %v2289_v10 = vadd.f32 %v2199_v42, %v2057_v49  ;;  %v4176_v42 = vpop.f32.mrf.mxu3  ;;  %v2481_v49 = vpop.permute.xlu0 %2480 }
 0x222   : > { %v2329_v8 = vadd.f32 %v4164_v1, %v2289_v10 }
 0x223   : > { %v1689_v47 = vpop.f32.mrf.mxu2  ;;  %v1538_v17 = vpop.f32.mrf.mxu1 }
 0x224   : > { %v1778_v41 = vadd.f32 %v1689_v47, %v1624_v2  ;;  %v2365_v31 = vmax.f32 %v2329_v8, 0.0  ;;  %v1625_v40 = vadd.f32 %v1538_v17, %v3779_v55  ;;  %v2458_v55 = vld [vmem:[%s4561_s3 + $0xa8] sm:$0xff] }
 0x225   : > { %2580 = vperm.xlu0 %3085, %v2458_v55  }
 0x226   : > { %v2058_v56 = vadd.f32 %v1969_v5, %v1778_v41  ;;  %2401 = vst [vmem:[%s4179_s7] sm:$0xff] %v2365_v31  ;;  %v2204_v4 = vpop.f32.mrf.mxu0  ;;  %2963 = vmatmul.msk.bf16.gmra.mxu1 %vm446_vm2, %v1450_v18  ;;  %v2456_v5 = vld [vmem:[%s4561_s3 + $0x98] sm:$0xff]  ;;  %v1865_v18 = vor.u32 %v1864_v15, %v1863_v52  ;;  %v2459_v52 = vld [vmem:[%s4561_s3 + $0xb0] sm:$0xff] }
 0x227   : > { %2570 = vperm.xlu1 %3086, %v2456_v5  }
 0x228   : > { %2982 = vmatmul.msk.bf16.gmra.mxu2 %vm446_vm2, %v1452_v6  ;;  %v2290_v43 = vadd.f32 %v2201_v16, %v2058_v56  ;;  %v4195_v37 = vpop.f32.mrf.mxu3  ;;  %v2653_v16 = vmul.f32 %v2476_v24, %v2365_v31  ;;  %v1866_v47 = vsel %vm1815_vm5, %v1861_v63, %v1865_v18  ;;  %v2486_v24 = vpop.permute.xlu1 %2485  ;;  %v1453_v63 = vrot.slane %v3447_v53, 2 }
 0x229   : > { %3020 = vmatmul.msk.bf16.gmra.mxu0 %vm446_vm2, %v2116_v19  ;;  %v2117_v19 = vrot.slane %v3447_v53, 3 }
 0x22a   : > { %v2330_v23 = vadd.f32 %v4164_v1, %v2290_v43 }
 0x22b   : > { %v1692_v35 = vpop.f32.mrf.mxu2  ;;  %v1540_v10 = vpop.f32.mrf.mxu1 }
 0x22c   : > { %v1779_v51 = vadd.f32 %v1692_v35, %v1625_v40  ;;  %v2366_v14 = vmax.f32 %v2330_v23, 0.0  ;;  %v1626_v31 = vadd.f32 %v1540_v10, %v3789_v30  ;;  %v1454_v35 = vsel %vm1429_vm6, %v1451_v34, %v1453_v63  ;;  %v2461_v10 = vld [vmem:[%s4561_s3 + $0xc0] sm:$0xff] }
 0x22d   : > { %3003 = vmatmul.msk.bf16.gmra.mxu3 %vm446_vm2, %v1866_v47  ;;  %v1867_v30 = vrot.slane %v3376_v62, 2  ;;  %v2118_v34 = vsel %vm2095_vm7, %v2115_v54, %v2117_v19  ;;  %2595 = vperm.xlu0 %3085, %v2461_v10  }
 0x22e   : > { %v2059_v2 = vadd.f32 %v4141_v21, %v1779_v51  ;;  %2402 = vst [vmem:[%s4179_s7 + $0x8] sm:$0xff] %v2366_v14  ;;  %v2654_v8 = vmul.f32 %v2481_v49, %v2366_v14  ;;  %v2206_v41 = vpop.f32.mrf.mxu0  ;;  %v2454_v21 = vld [vmem:[%s4561_s3 + $0x88] sm:$0xff]  ;;  %v1868_v14 = vrot.slane %v3373_v61, 3 }
 0x22f   : > { %2585 = vperm.xlu1 %3086, %v2459_v52   ;;  %2560 = vperm.xlu2 %3087, %v2454_v21   ;;  %v2462_v61 = vld [vmem:[%s4561_s3 + $0xc8] sm:$0xff]  ;;  %v2464_v21 = vld [vmem:[%s4561_s3 + $0xd8] sm:$0xff] }
 0x230   : > { %v2291_v17 = vadd.f32 %v2204_v4, %v2059_v2  ;;  %v2689_v56 = vadd.f32 %v2654_v8, %v2653_v16  ;;  %v4214_v23 = vpop.f32.mrf.mxu3  ;;  %v4239_v59 = vor.u32 %v1868_v14, %v1867_v30  ;;  %v2491_v8 = vpop.permute.xlu1 %2490 }
 0x232   : > { %v2331_v15 = vadd.f32 %v4164_v1, %v2291_v17 }
 0x233   : > { %v1694_v4 = vpop.f32.mrf.mxu2  ;;  %v1543_v40 = vpop.f32.mrf.mxu1 }
 0x234   : > { %v1780_v43 = vadd.f32 %v1694_v4, %v1626_v31  ;;  %v2367_v5 = vmax.f32 %v2331_v15, 0.0  ;;  %v1627_v2 = vadd.f32 %v1543_v40, %v3799_v9  ;;  %v1870_v9 = vsel %vm1815_vm5, %v1865_v18, %v4239_v59  ;;  %v2465_v4 = vld [vmem:[%s4561_s3 + $0xe0] sm:$0xff] }
 0x235   : > { %2610 = vperm.xlu0 %3085, %v2464_v21   ;;  %v1455_v18 = vrot.slane %v3520_v45, 2 }
 0x236   : > { %v2060_v49 = vadd.f32 %v4159_v38, %v1780_v43  ;;  %2403 = vst [vmem:[%s4179_s7 + $0x10] sm:$0xff] %v2367_v5  ;;  %v2655_v51 = vmul.f32 %v2486_v24, %v2367_v5  ;;  %v2209_v16 = vpop.f32.mrf.mxu0  ;;  %2964 = vmatmul.msk.bf16.gmra.mxu1 %vm446_vm2, %v1452_v6  ;;  %v2496_v43 = vpop.permute.xlu2 %2495 }
 0x237   : > { %2600 = vperm.xlu1 %3086, %v2462_v61   ;;  %v1872_v61 = vrot.slane %v3381_v0, 3  ;;  %v2468_v0 = vld [vmem:[%s4561_s3 + $0xf8] sm:$0xff] }
 0x238   : > { %v2690_v38 = vadd.f32 %v2689_v56, %v2655_v51  ;;  %2983 = vmatmul.msk.bf16.gmra.mxu2 %vm446_vm2, %v1454_v35  ;;  %v2292_v62 = vadd.f32 %v2206_v41, %v2060_v49  ;;  %v4241_v56 = vpop.f32.mrf.mxu3  ;;  %v2119_v51 = vrot.slane %v3520_v45, 3  ;;  %v2511_v45 = vpop.permute.xlu1 %2510 }
 0x239   : > { %3021 = vmatmul.msk.bf16.gmra.mxu0 %vm446_vm2, %v2118_v34  ;;  %v1456_v34 = vsel %vm1429_vm6, %v1453_v63, %v1455_v18 }
 0x23a   : > { %v2332_v6 = vadd.f32 %v4164_v1, %v2292_v62  ;;  %v1871_v62 = vrot.slane %v3432_v46, 2  ;;  %v2120_v63 = vsel %vm2095_vm7, %v2117_v19, %v2119_v51  ;;  %v2460_v19 = vld [vmem:[%s4561_s3 + $0xb8] sm:$0xff] }
 0x23b   : > { %v1697_v54 = vpop.f32.mrf.mxu2  ;;  %v1545_v17 = vpop.f32.mrf.mxu1 }
 0x23c   : > { %v1781_v47 = vadd.f32 %v1697_v54, %v1627_v2  ;;  %v2368_v55 = vmax.f32 %v2332_v6, 0.0  ;;  %v1628_v5 = vadd.f32 %v1545_v17, %v3809_v27  ;;  %v2467_v2 = vld [vmem:[%s4561_s3 + $0xf0] sm:$0xff]  ;;  %v1873_v53 = vor.u32 %v1872_v61, %v1871_v62 }
 0x23d   : > { %3004 = vmatmul.msk.bf16.gmra.mxu3 %vm446_vm2, %v1870_v9  ;;  %2625 = vperm.xlu0 %3085, %v2467_v2   ;;  %v1875_v2 = vrot.slane %v3513_v39, 2 }
 0x23e   : > { %v2061_v41 = vadd.f32 %v4176_v42, %v1781_v47  ;;  %2404 = vst [vmem:[%s4179_s7 + $0x18] sm:$0xff] %v2368_v55  ;;  %v2656_v52 = vmul.f32 %v2491_v8, %v2368_v55  ;;  %v2211_v24 = vpop.f32.mrf.mxu0  ;;  %v2457_v42 = vld [vmem:[%s4561_s3 + $0xa0] sm:$0xff]  ;;  %v2501_v47 = vpop.permute.xlu2 %2500  ;;  %v1874_v21 = vsel %vm1815_vm5, %v4239_v59, %v1873_v53 }
 0x23f   : > { %2615 = vperm.xlu1 %3086, %v2465_v4   ;;  %2575 = vperm.xlu2 %3087, %v2457_v42   ;;  %v2471_v42 = vld [vmem:[%s4561_s3 + $0x110] sm:$0xff] }
 0x240   : > { %v2293_v31 = vadd.f32 %v2209_v16, %v2061_v41  ;;  %v2691_v15 = vadd.f32 %v2690_v38, %v2656_v52  ;;  %v4261_v16 = vpop.f32.mrf.mxu3 }
 0x242   : > { %v2333_v40 = vadd.f32 %v4164_v1, %v2293_v31 }
 0x243   : > { %v1699_v49 = vpop.f32.mrf.mxu2  ;;  %v1548_v10 = vpop.f32.mrf.mxu1 }
 0x244   : > { %v1782_v30 = vadd.f32 %v1699_v49, %v1628_v5  ;;  %v2369_v14 = vmax.f32 %v2333_v40, 0.0  ;;  %v1629_v54 = vadd.f32 %v1548_v10, %v3819_v28  ;;  %v2506_v49 = vpop.permute.xlu0 %2505 }
 0x246   : > { %v2062_v38 = vadd.f32 %v4195_v37, %v1782_v30  ;;  %2405 = vst [vmem:[%s4179_s7 + $0x20] sm:$0xff] %v2369_v14  ;;  %v2657_v27 = vmul.f32 %v2496_v43, %v2369_v14  ;;  %v2214_v6 = vpop.f32.mrf.mxu0  ;;  %2965 = vmatmul.msk.bf16.gmra.mxu1 %vm446_vm2, %v1454_v35  ;;  %v1457_v43 = vrot.slane %v3364_v57, 2  ;;  %v2121_v30 = vrot.slane %v3364_v57, 3 }
 0x247   : > { %2630 = vperm.xlu1 %3086, %v2468_v0   ;;  %2590 = vperm.xlu2 %3087, %v2460_v19  }
 0x248   : > { %v2692_v37 = vadd.f32 %v2691_v15, %v2657_v27  ;;  %2984 = vmatmul.msk.bf16.gmra.mxu2 %vm446_vm2, %v1456_v34  ;;  %v2294_v46 = vadd.f32 %v2211_v24, %v2062_v38  ;;  %v4291_v52 = vpop.f32.mrf.mxu3  ;;  %v2470_v24 = vld [vmem:[%s4561_s3 + $0x108] sm:$0xff]  ;;  %v1458_v62 = vsel %vm1429_vm6, %v1455_v18, %v1457_v43  ;;  %v2122_v57 = vsel %vm2095_vm7, %v2119_v51, %v2121_v30 }
 0x249   : > { %3022 = vmatmul.msk.bf16.gmra.mxu0 %vm446_vm2, %v2120_v63  ;;  %2640 = vperm.xlu0 %3085, %v2470_v24   ;;  %v4718_v24 = vld [vmem:[#allocation55_spill] sm:$0xff] }
 0x24a   : > { %v2334_v35 = vadd.f32 %v4164_v1, %v2294_v46  ;;  %v4717_v46 = vld [vmem:[#allocation54_spill] sm:$0xff] }
 0x24b   : > { %v1702_v8 = vpop.f32.mrf.mxu2  ;;  %v1550_v41 = vpop.f32.mrf.mxu1 }
 0x24c   : > { %v1783_v55 = vadd.f32 %v1702_v8, %v1629_v54  ;;  %v2370_v17 = vmax.f32 %v2334_v35, 0.0  ;;  %v1630_v59 = vadd.f32 %v1550_v41, %v3829_v50 }
 0x24d   : > { %3005 = vmatmul.msk.bf16.gmra.mxu3 %vm446_vm2, %v1874_v21  ;;  %v1459_v21 = vrot.slane %v3369_v60, 2 }
 0x24e   : > { %v2063_v9 = vadd.f32 %v4214_v23, %v1783_v55  ;;  %2406 = vst [vmem:[%s4179_s7 + $0x28] sm:$0xff] %v2370_v17  ;;  %v2658_v28 = vmul.f32 %v2501_v47, %v2370_v17  ;;  %v2216_v31 = vpop.f32.mrf.mxu0  ;;  %v2463_v23 = vld [vmem:[%s4561_s3 + $0xd0] sm:$0xff] }
 0x24f   : > { %2645 = vperm.xlu1 %3086, %v2471_v42   ;;  %2605 = vperm.xlu2 %3087, %v2463_v23  }
 0x250   : > { %v2295_v15 = vadd.f32 %v2214_v6, %v2063_v9  ;;  %v2693_v4 = vadd.f32 %v2692_v37, %v2658_v28  ;;  %v4311_v27 = vpop.f32.mrf.mxu3  ;;  %v1876_v6 = vrot.slane %v4660_v11, 3  ;;  %v2466_v11 = vld [vmem:[%s4561_s3 + $0xe8] sm:$0xff]  ;;  %v2469_v28 = vld [vmem:[%s4561_s3 + $0x100] sm:$0xff] }
 0x252   : > { %v2335_v5 = vadd.f32 %v4164_v1, %v2295_v15  ;;  %v1877_v0 = vor.u32 %v1876_v6, %v1875_v2 }
 0x253   : > { %v1704_v40 = vpop.f32.mrf.mxu2  ;;  %v1553_v38 = vpop.f32.mrf.mxu1 }
 0x254   : > { %v1784_v14 = vadd.f32 %v1704_v40, %v1630_v59  ;;  %v2371_v10 = vmax.f32 %v2335_v5, 0.0  ;;  %v1878_v55 = vsel %vm1815_vm5, %v1873_v53, %v1877_v0  ;;  %v2123_v53 = vrot.slane %v3369_v60, 3 }
 0x255   : > { %v1460_v40 = vsel %vm1429_vm6, %v1457_v43, %v1459_v21 }
 0x256   : > { %v2064_v61 = vadd.f32 %v4241_v56, %v1784_v14  ;;  %2407 = vst [vmem:[%s4179_s7 + $0x30] sm:$0xff] %v2371_v10  ;;  %v2659_v50 = vmul.f32 %v2506_v49, %v2371_v10  ;;  %v2219_v63 = vpop.f32.mrf.mxu0  ;;  %2966 = vmatmul.msk.bf16.gmra.mxu1 %vm446_vm2, %v1456_v34  ;;  %v1631_v56 = vadd.f32 %v1553_v38, %v4717_v46  ;;  %v4719_v10 = vshrl.u32 %v3869_v13, 16 }
 0x257   : > { %2620 = vperm.xlu2 %3087, %v2466_v11   ;;  %v2124_v2 = vsel %vm2095_vm7, %v2121_v30, %v2123_v53  ;;  %v2521_v30 = vpop.permute.xlu0 %2520 }
 0x258   : > { %v2694_v37 = vadd.f32 %v2693_v4, %v2659_v50  ;;  %2985 = vmatmul.msk.bf16.gmra.mxu2 %vm446_vm2, %v1458_v62  ;;  %v2296_v18 = vadd.f32 %v2216_v31, %v2064_v61  ;;  %v4331_v19 = vpop.f32.mrf.mxu3  ;;  %v2516_v4 = vpop.permute.xlu2 %2515  ;;  %v1879_v38 = vrot.slane %v4719_v10, 2  ;;  %v4720_v61 = vshll.u32 %v3869_v13, 16 }
 0x259   : > { %3023 = vmatmul.msk.bf16.gmra.mxu0 %vm446_vm2, %v2122_v57 }
 0x25a   : > { %v2336_v39 = vadd.f32 %v4164_v1, %v2296_v18  ;;  %v1880_v50 = vrot.slane %v4720_v61, 3  ;;  %v2472_v18 = vld [vmem:[%s4561_s3 + $0x118] sm:$0xff] }
 0x25b   : > { %v1707_v34 = vpop.f32.mrf.mxu2  ;;  %v1555_v35 = vpop.f32.mrf.mxu1 }
 0x25c   : > { %v1785_v51 = vadd.f32 %v1707_v34, %v1631_v56  ;;  %v2372_v54 = vmax.f32 %v2336_v39, 0.0  ;;  %v1632_v31 = vadd.f32 %v1555_v35, %v4718_v24 }
 0x25d   : > { %3006 = vmatmul.msk.bf16.gmra.mxu3 %vm446_vm2, %v1878_v55 }
 0x25e   : > { %v2065_v8 = vadd.f32 %v4261_v16, %v1785_v51  ;;  %2408 = vst [vmem:[%s4179_s7 + $0x38] sm:$0xff] %v2372_v54  ;;  %v2660_v47 = vmul.f32 %v2511_v45, %v2372_v54  ;;  %v2221_v17 = vpop.f32.mrf.mxu0  ;;  %v3089_v45 = vld [vmem:[%s3289_s17 + $0x130] sm:$0xff] }
 0x25f   : > { %2635 = vperm.xlu2 %3087, %v2469_v28  }
 0x260   : > { %v2297_v41 = vadd.f32 %v2219_v63, %v2065_v8  ;;  %v2695_v9 = vadd.f32 %v2694_v37, %v2660_v47  ;;  %v4344_v5 = vpop.f32.mrf.mxu3  ;;  %v1881_v37 = vor.u32 %v1880_v50, %v1879_v38 }
 0x262   : > { %v2337_v16 = vadd.f32 %v4164_v1, %v2297_v41  ;;  %v1882_v8 = vsel %vm1815_vm5, %v1877_v0, %v1881_v37  ;;  %v1461_v41 = vrot.slane %v3418_v36, 2  ;;  %v2125_v0 = vrot.slane %v3418_v36, 3 }
 0x263   : > { %v1709_v15 = vpop.f32.mrf.mxu2  ;;  %v1558_v59 = vpop.f32.mrf.mxu1 }
 0x264   : > { %v1786_v42 = vadd.f32 %v1709_v15, %v1632_v31  ;;  %v2373_v23 = vmax.f32 %v2337_v16, 0.0  ;;  %v2526_v15 = vpop.permute.xlu1 %2525 }
 0x266   : > { %v2066_v49 = vadd.f32 %v4291_v52, %v1786_v42  ;;  %2409 = vst [vmem:[%s4179_s7 + $0x40] sm:$0xff] %v2373_v23  ;;  %v2661_v14 = vmul.f32 %v2516_v4, %v2373_v23  ;;  %v2224_v60 = vpop.f32.mrf.mxu0  ;;  %2967 = vmatmul.msk.bf16.gmra.mxu1 %vm446_vm2, %v1458_v62  ;;  %v4721_v52 = vld [vmem:[#allocation56_spill] sm:$0xff]  ;;  %v273_v62 = vld [vmem:[%s3289_s17 + $0x138] sm:$0xff] }
 0x267   : > { %v1633_v63 = vadd.f32 %v1558_v59, %v4721_v52  ;;  %2650 = vperm.xlu2 %3087, %v2472_v18   ;;  %v4366_v51 = vpack.c.bf16 %v273_v62, %v3089_v45  ;;  %v2531_v52 = vpop.permute.xlu2 %2530  ;;  %v4398_v45 = vrot.slane %v3869_v13, 2 }
 0x268   : > { %v2696_v6 = vadd.f32 %v2695_v9, %v2661_v14  ;;  %2986 = vmatmul.msk.bf16.gmra.mxu2 %vm446_vm2, %v1460_v40  ;;  %v2298_v43 = vadd.f32 %v2221_v17, %v2066_v49  ;;  %v4363_v34 = vpop.f32.mrf.mxu3  ;;  %v4722_v9 = vld [vmem:[#allocation30_spill] sm:$0xff]  ;;  %v1462_v49 = vsel %vm1429_vm6, %v1459_v21, %v1461_v41 }
 0x269   : > { %3024 = vmatmul.msk.bf16.gmra.mxu0 %vm446_vm2, %v2124_v2  ;;  %v1884_v31 = vshrl.u32 %v4366_v51, 16 }
 0x26a   : > { %v2338_v57 = vadd.f32 %v4164_v1, %v2298_v43 }
 0x26b   : > { %v1712_v46 = vpop.f32.mrf.mxu2  ;;  %v1560_v11 = vpop.f32.mrf.mxu1  ;;  %v1886_v38 = vrot.slane %v1884_v31, 2 }
 0x26c   : > { %v1787_v56 = vadd.f32 %v1712_v46, %v1633_v63  ;;  %v2374_v39 = vmax.f32 %v2338_v57, 0.0  ;;  %v1634_v28 = vadd.f32 %v1560_v11, %v4722_v9  ;;  %v274_v63 = vld [vmem:[%s3289_s17 + $0x140] sm:$0x3f] }
 0x26d   : > { %3007 = vmatmul.msk.bf16.gmra.mxu3 %vm446_vm2, %v1882_v8 }
 0x26e   : > { %v2067_v54 = vadd.f32 %v4311_v27, %v1787_v56  ;;  %2410 = vst [vmem:[%s4179_s7 + $0x48] sm:$0xff] %v2374_v39  ;;  %v2662_v35 = vmul.f32 %v2521_v30, %v2374_v39  ;;  %v2226_v47 = vpop.f32.mrf.mxu0  ;;  %v1887_v27 = vshll.u32 %v4366_v51, 16 }
 0x270   : > { %v2299_v55 = vadd.f32 %v2224_v60, %v2067_v54  ;;  %v2697_v17 = vadd.f32 %v2696_v6, %v2662_v35  ;;  %v4378_v59 = vpop.f32.mrf.mxu3  ;;  %v1889_v61 = vrot.slane %v1887_v27, 3  ;;  %v2126_v60 = vsel %vm2095_vm7, %v2123_v53, %v2125_v0  ;;  %v4723_v54 = vld [vmem:[#allocation22_spill] sm:$0xff] }
 0x271   : > { %v1464_v27 = vsel %vm1429_vm6, %v1461_v41, %v4398_v45 }
 0x272   : > { %v2339_v24 = vadd.f32 %v4164_v1, %v2299_v55  ;;  %v1890_v21 = vor.u32 %v1889_v61, %v1886_v38  ;;  %v2536_v55 = vpop.permute.xlu0 %2535 }
 0x273   : > { %v1714_v16 = vpop.f32.mrf.mxu2  ;;  %v1563_v23 = vpop.f32.mrf.mxu1 }
 0x274   : > { %v1788_v4 = vadd.f32 %v1714_v16, %v1634_v28  ;;  %v2375_v42 = vmax.f32 %v2339_v24, 0.0  ;;  %v1635_v6 = vadd.f32 %v1563_v23, %v3885_v48  ;;  %v1891_v30 = vsel %vm1815_vm5, %v1881_v37, %v1890_v21 }
 0x275   : > { %v4395_v48 = vpack.c.bf16 %v274_v63, %v274_v63  ;;  %v1665_v63 = vrot.slane %v4366_v51, 2 }
 0x276   : > { %v2068_v14 = vadd.f32 %v4331_v19, %v1788_v4  ;;  %2411 = vst [vmem:[%s4179_s7 + $0x50] sm:$0xff] %v2375_v42  ;;  %v2663_v10 = vmul.f32 %v2526_v15, %v2375_v42  ;;  %v2229_v50 = vpop.f32.mrf.mxu0  ;;  %2968 = vmatmul.msk.bf16.gmra.mxu1 %vm446_vm2, %v1460_v40 }
 0x278   : > { %v2698_v36 = vadd.f32 %v2697_v17, %v2663_v10  ;;  %2987 = vmatmul.msk.bf16.gmra.mxu2 %vm446_vm2, %v1462_v49  ;;  %v2300_v2 = vadd.f32 %v2226_v47, %v2068_v14  ;;  %v4390_v62 = vpop.f32.mrf.mxu3  ;;  %v1896_v47 = vshll.u32 %v4395_v48, 16  ;;  %v2127_v17 = vrot.slane %v3869_v13, 3 }
 0x279   : > { %3025 = vmatmul.msk.bf16.gmra.mxu0 %vm446_vm2, %v2126_v60 }
 0x27a   : > { %v2340_v19 = vadd.f32 %v4164_v1, %v2300_v2  ;;  %v1898_v42 = vrot.slane %v1896_v47, 3  ;;  %v2128_v14 = vsel %vm2095_vm7, %v2125_v0, %v2127_v17 }
 0x27b   : > { %v1717_v43 = vpop.f32.mrf.mxu2  ;;  %v1565_v40 = vpop.f32.mrf.mxu1 }
 0x27c   : > { %v1789_v57 = vadd.f32 %v1717_v43, %v1635_v6  ;;  %v2376_v18 = vmax.f32 %v2340_v19, 0.0  ;;  %v1636_v35 = vadd.f32 %v1565_v40, %v4723_v54 }
 0x27d   : > { %3008 = vmatmul.msk.bf16.gmra.mxu3 %vm446_vm2, %v1891_v30 }
 0x27e   : > { %v2069_v53 = vadd.f32 %v4344_v5, %v1789_v57  ;;  %2412 = vst [vmem:[%s4179_s7 + $0x58] sm:$0xff] %v2376_v18  ;;  %v2664_v46 = vmul.f32 %v2531_v52, %v2376_v18  ;;  %v2231_v56 = vpop.f32.mrf.mxu0  ;;  %v1893_v5 = vshrl.u32 %v4395_v48, 16 }
 0x280   : > { %v2301_v39 = vadd.f32 %v2229_v50, %v2069_v53  ;;  %v2699_v11 = vadd.f32 %v2698_v36, %v2664_v46  ;;  %v2007_v31 = vpop.f32.mrf.mxu3  ;;  %v1895_v4 = vrot.slane %v1893_v5, 2  ;;  %v2541_v50 = vpop.permute.xlu1 %2540 }
 0x281   : > { %v2546_v53 = vpop.permute.xlu2 %2545 }
 0x282   : > { %v2341_v8 = vadd.f32 %v4164_v1, %v2301_v39  ;;  %v1899_v41 = vor.u32 %v1898_v42, %v1895_v4  ;;  %v1666_v39 = vsel %vm1429_vm6, %v4398_v45, %v1665_v63  ;;  %v1465_v42 = vrot.slane %v3890_v25, 2 }
 0x283   : > { %v1719_v37 = vpop.f32.mrf.mxu2  ;;  %v1568_v24 = vpop.f32.mrf.mxu1 }
 0x284   : > { %v1790_v9 = vadd.f32 %v1719_v37, %v1636_v35  ;;  %v2377_v28 = vmax.f32 %v2341_v8, 0.0  ;;  %v1637_v38 = vadd.f32 %v1568_v24, %v3909_v3  ;;  %v1900_v19 = vsel %vm1815_vm5, %v1890_v21, %v1899_v41 }
 0x286   : > { %v2070_v16 = vadd.f32 %v4363_v34, %v1790_v9  ;;  %2413 = vst [vmem:[%s4179_s7 + $0x60] sm:$0xff] %v2377_v28  ;;  %v2665_v15 = vmul.f32 %v2536_v55, %v2377_v28  ;;  %v2234_v23 = vpop.f32.mrf.mxu0  ;;  %2969 = vmatmul.msk.bf16.gmra.mxu1 %vm446_vm2, %v1462_v49 }
 0x288   : > { %v2302_v13 = vadd.f32 %v2231_v56, %v2070_v16  ;;  %v2700_v10 = vadd.f32 %v2699_v11, %v2665_v15  ;;  %2988 = vmatmul.msk.bf16.gmra.mxu2 %vm446_vm2, %v1464_v27  ;;  %v2009_v49 = vpop.f32.mrf.mxu3 }
 0x289   : > { %3026 = vmatmul.msk.bf16.gmra.mxu0 %vm446_vm2, %v2128_v14 }
 0x28a   : > { %v2342_v34 = vadd.f32 %v4164_v1, %v2302_v13 }
 0x28b   : > { %v1722_v61 = vpop.f32.mrf.mxu2  ;;  %v1570_v2 = vpop.f32.mrf.mxu1 }
 0x28c   : > { %v1791_v60 = vadd.f32 %v1722_v61, %v1637_v38  ;;  %v2378_v36 = vmax.f32 %v2342_v34, 0.0  ;;  %v1638_v57 = vadd.f32 %v1570_v2, %v3922_v44  ;;  %v2131_v38 = vrot.slane %v4395_v48, 3 }
 0x28d   : > { %3009 = vmatmul.msk.bf16.gmra.mxu3 %vm446_vm2, %v1900_v19  ;;  %v1466_v61 = vsel %vm1429_vm6, %v4398_v45, %v1465_v42 }
 0x28e   : > { %v2071_v6 = vadd.f32 %v4378_v59, %v1791_v60  ;;  %2414 = vst [vmem:[%s4179_s7 + $0x68] sm:$0xff] %v2378_v36  ;;  %v2666_v0 = vmul.f32 %v2541_v50, %v2378_v36  ;;  %v2236_v43 = vpop.f32.mrf.mxu0  ;;  %v2129_v59 = vrot.slane %v4366_v51, 3 }
 0x290   : > { %v2303_v3 = vadd.f32 %v2234_v23, %v2071_v6  ;;  %v2701_v52 = vadd.f32 %v2700_v10, %v2666_v0  ;;  %v2012_v21 = vpop.f32.mrf.mxu3  ;;  %v2130_v44 = vsel %vm2095_vm7, %v2127_v17, %v2129_v59  ;;  %v2556_v10 = vpop.permute.xlu1 %2555  ;;  %v4724_v0 = vld [vmem:[#allocation21_spill] sm:$0xff] }
 0x292   : > { %v2343_v18 = vadd.f32 %v4164_v1, %v2303_v3 }
 0x293   : > { %v1724_v40 = vpop.f32.mrf.mxu2  ;;  %v1573_v56 = vpop.f32.mrf.mxu1 }
 0x294   : > { %v1792_v46 = vadd.f32 %v1724_v40, %v1638_v57  ;;  %v2379_v30 = vmax.f32 %v2343_v18, 0.0  ;;  %v1639_v51 = vadd.f32 %v1573_v56, %v3929_v12  ;;  %v1667_v12 = vrot.slane %v4395_v48, 2 }
 0x296   : > { %v2072_v11 = vadd.f32 %v4390_v62, %v1792_v46  ;;  %2415 = vst [vmem:[%s4179_s7 + $0x70] sm:$0xff] %v2379_v30  ;;  %v2667_v54 = vmul.f32 %v2546_v53, %v2379_v30  ;;  %v2239_v35 = vpop.f32.mrf.mxu0  ;;  %2970 = vmatmul.msk.bf16.gmra.mxu1 %vm446_vm2, %v1464_v27  ;;  %v2551_v62 = vpop.permute.xlu0 %2550  ;;  %v1668_v60 = vsel %vm1429_vm6, %v1665_v63, %v1667_v12  ;;  %v4725_v30 = vld [vmem:[#allocation32_spill] sm:$0xff] }
 0x298   : > { %v2304_v8 = vadd.f32 %v2236_v43, %v2072_v11  ;;  %v2702_v5 = vadd.f32 %v2701_v52, %v2667_v54  ;;  %2989 = vmatmul.msk.bf16.gmra.mxu2 %vm446_vm2, %v1666_v39  ;;  %v2014_v24 = vpop.f32.mrf.mxu3 }
 0x299   : > { %3027 = vmatmul.msk.bf16.gmra.mxu0 %vm446_vm2, %v2130_v44 }
 0x29a   : > { %v2344_v47 = vadd.f32 %v4164_v1, %v2304_v8 }
 0x29b   : > { %v1727_v37 = vpop.f32.mrf.mxu2  ;;  %v1575_v28 = vpop.f32.mrf.mxu1 }
 0x29c   : > { %v1793_v55 = vadd.f32 %v1727_v37, %v1639_v51  ;;  %v2380_v9 = vmax.f32 %v2344_v47, 0.0  ;;  %v1640_v23 = vadd.f32 %v1575_v28, %v3942_v20  ;;  %v2132_v20 = vsel %vm2095_vm7, %v2129_v59, %v2131_v38  ;;  %v4727_v38 = vld [vmem:[#allocation33_spill] sm:$0xff] }
 0x29e   : > { %v2073_v16 = vadd.f32 %v2007_v31, %v1793_v55  ;;  %2416 = vst [vmem:[%s4179_s7 + $0x78] sm:$0xff] %v2380_v9  ;;  %v2668_v27 = vmul.f32 %v2551_v62, %v2380_v9  ;;  %v2241_v17 = vpop.f32.mrf.mxu0  ;;  %v2566_v54 = vpop.permute.xlu0 %2565  ;;  %v4726_v55 = vld [vmem:[#allocation47_spill] sm:$0xff] }
 0x2a0   : > { %v2305_v15 = vadd.f32 %v2239_v35, %v2073_v16  ;;  %v2703_v4 = vadd.f32 %v2702_v5, %v2668_v27  ;;  %v2017_v50 = vpop.f32.mrf.mxu3 }
 0x2a2   : > { %v2345_v14 = vadd.f32 %v4164_v1, %v2305_v15 }
 0x2a3   : > { %v1729_v13 = vpop.f32.mrf.mxu2  ;;  %v1578_v41 = vpop.f32.mrf.mxu1 }
 0x2a4   : > { %v1794_v34 = vadd.f32 %v1729_v13, %v1640_v23  ;;  %v2381_v31 = vmax.f32 %v2345_v14, 0.0  ;;  %v1641_v19 = vadd.f32 %v1578_v41, %v4724_v0 }
 0x2a6   : > { %v2074_v25 = vadd.f32 %v2009_v49, %v1794_v34  ;;  %2417 = vst [vmem:[%s4179_s7 + $0x80] sm:$0xff] %v2381_v31  ;;  %v2669_v36 = vmul.f32 %v2556_v10, %v2381_v31  ;;  %v2244_v2 = vpop.f32.mrf.mxu0  ;;  %2971 = vmatmul.msk.bf16.gmra.mxu1 %vm446_vm2, %v1466_v61  ;;  %v2561_v49 = vpop.permute.xlu2 %2560 }
 0x2a8   : > { %v2306_v6 = vadd.f32 %v2241_v17, %v2074_v25  ;;  %v2704_v48 = vadd.f32 %v2703_v4, %v2669_v36  ;;  %2990 = vmatmul.msk.bf16.gmra.mxu2 %vm446_vm2, %v1668_v60  ;;  %v2019_v57 = vpop.f32.mrf.mxu3  ;;  %v2571_v4 = vpop.permute.xlu1 %2570 }
 0x2a9   : > { %3028 = vmatmul.msk.bf16.gmra.mxu0 %vm446_vm2, %v2132_v20 }
 0x2aa   : > { %v2346_v45 = vadd.f32 %v4164_v1, %v2306_v6 }
 0x2ab   : > { %v1732_v43 = vpop.f32.mrf.mxu2  ;;  %v1580_v63 = vpop.f32.mrf.mxu1 }
 0x2ac   : > { %v1795_v3 = vadd.f32 %v1732_v43, %v1641_v19  ;;  %v2382_v52 = vmax.f32 %v2346_v45, 0.0  ;;  %v1642_v56 = vadd.f32 %v1580_v63, %v4725_v30  ;;  %v4728_v19 = vld [vmem:[#allocation31_spill] sm:$0xff]  ;;  %v2581_v63 = vpop.permute.xlu0 %2580 }
 0x2ae   : > { %v2075_v18 = vadd.f32 %v2012_v21, %v1795_v3  ;;  %2418 = vst [vmem:[%s4179_s7 + $0x88] sm:$0xff] %v2382_v52  ;;  %v2670_v40 = vmul.f32 %v2561_v49, %v2382_v52  ;;  %v2246_v53 = vpop.f32.mrf.mxu0  ;;  %v2576_v25 = vpop.permute.xlu2 %2575 }
 0x2b0   : > { %v2307_v59 = vadd.f32 %v2244_v2, %v2075_v18  ;;  %v2705_v46 = vadd.f32 %v2704_v48, %v2670_v40  ;;  %v2022_v5 = vpop.f32.mrf.mxu3 }
 0x2b2   : > { %v2347_v39 = vadd.f32 %v4164_v1, %v2307_v59 }
 0x2b3   : > { %v1734_v11 = vpop.f32.mrf.mxu2  ;;  %v1583_v8 = vpop.f32.mrf.mxu1 }
 0x2b4   : > { %v1796_v35 = vadd.f32 %v1734_v11, %v1642_v56  ;;  %v2383_v44 = vmax.f32 %v2347_v39, 0.0  ;;  %v1643_v9 = vadd.f32 %v1583_v8, %v4726_v55  ;;  %v4729_v56 = vld [vmem:[#allocation50_spill] sm:$0xff]  ;;  %v2586_v8 = vpop.permute.xlu1 %2585  ;;  %v4730_v55 = vld [vmem:[#allocation15_spill] sm:$0xff] }
 0x2b6   : > { %v2076_v51 = vadd.f32 %v2014_v24, %v1796_v35  ;;  %2419 = vst [vmem:[%s4179_s7 + $0x90] sm:$0xff] %v2383_v44  ;;  %v2671_v47 = vmul.f32 %v2566_v54, %v2383_v44  ;;  %v2249_v21 = vpop.f32.mrf.mxu0 }
 0x2b8   : > { %v2308_v37 = vadd.f32 %v2246_v53, %v2076_v51  ;;  %v2706_v62 = vadd.f32 %v2705_v46, %v2671_v47  ;;  %v2024_v42 = vpop.f32.mrf.mxu3 }
 0x2ba   : > { %v2348_v28 = vadd.f32 %v4164_v1, %v2308_v37 }
 0x2bb   : > { %v1737_v16 = vpop.f32.mrf.mxu2  ;;  %v1585_v15 = vpop.f32.mrf.mxu1 }
 0x2bc   : > { %v2384_v27 = vmax.f32 %v2348_v28, 0.0  ;;  %v1797_v17 = vadd.f32 %v1737_v16, %v1643_v9  ;;  %v1644_v34 = vadd.f32 %v1585_v15, %v4727_v38 }
 0x2be   : > { %2420 = vst [vmem:[%s4179_s7 + $0x98] sm:$0xff] %v2384_v27  ;;  %v2672_v12 = vmul.f32 %v2571_v4, %v2384_v27  ;;  %v2077_v23 = vadd.f32 %v2017_v50, %v1797_v17  ;;  %v2251_v24 = vpop.f32.mrf.mxu0  ;;  %v2591_v4 = vpop.permute.xlu2 %2590 }
 0x2c0   : > { %v2707_v14 = vadd.f32 %v2706_v62, %v2672_v12  ;;  %v2309_v13 = vadd.f32 %v2249_v21, %v2077_v23  ;;  %v2027_v6 = vpop.f32.mrf.mxu3 }
 0x2c2   : > { %v2349_v10 = vadd.f32 %v4164_v1, %v2309_v13 }
 0x2c3   : > { %v1739_v31 = vpop.f32.mrf.mxu2  ;;  %v1588_v60 = vpop.f32.mrf.mxu1 }
 0x2c4   : > { %v2385_v41 = vmax.f32 %v2349_v10, 0.0  ;;  %v1798_v61 = vadd.f32 %v1739_v31, %v1644_v34  ;;  %v1645_v45 = vadd.f32 %v1588_v60, %v4728_v19  ;;  %v4731_v10 = vld [vmem:[#allocation17_spill] sm:$0xff]  ;;  %v2596_v60 = vpop.permute.xlu0 %2595 }
 0x2c6   : > { %2421 = vst [vmem:[%s4179_s7 + $0xa0] sm:$0xff] %v2385_v41  ;;  %v2673_v36 = vmul.f32 %v2576_v25, %v2385_v41  ;;  %v2078_v2 = vadd.f32 %v2019_v57, %v1798_v61  ;;  %v2254_v20 = vpop.f32.mrf.mxu0 }
 0x2c8   : > { %v2708_v48 = vadd.f32 %v2707_v14, %v2673_v36  ;;  %v2310_v50 = vadd.f32 %v2251_v24, %v2078_v2  ;;  %v2029_v46 = vpop.f32.mrf.mxu3 }
 0x2ca   : > { %v2350_v0 = vadd.f32 %v4164_v1, %v2310_v50 }
 0x2cb   : > { %v1742_v43 = vpop.f32.mrf.mxu2  ;;  %v1590_v52 = vpop.f32.mrf.mxu1 }
 0x2cc   : > { %v2386_v49 = vmax.f32 %v2350_v0, 0.0  ;;  %v1799_v3 = vadd.f32 %v1742_v43, %v1645_v45  ;;  %v1646_v39 = vadd.f32 %v1590_v52, %v4729_v56  ;;  %v4732_v0 = vld [vmem:[#allocation26_spill] sm:$0xff]  ;;  %v2601_v52 = vpop.permute.xlu1 %2600 }
 0x2ce   : > { %2422 = vst [vmem:[%s4179_s7 + $0xa8] sm:$0xff] %v2386_v49  ;;  %v2674_v18 = vmul.f32 %v2581_v63, %v2386_v49  ;;  %v2079_v40 = vadd.f32 %v2022_v5, %v1799_v3  ;;  %v2256_v53 = vpop.f32.mrf.mxu0 }
 0x2d0   : > { %v2709_v59 = vadd.f32 %v2708_v48, %v2674_v18  ;;  %v2311_v57 = vadd.f32 %v2254_v20, %v2079_v40  ;;  %v2032_v16 = vpop.f32.mrf.mxu3 }
 0x2d2   : > { %v2351_v30 = vadd.f32 %v4164_v1, %v2311_v57 }
 0x2d3   : > { %v1744_v11 = vpop.f32.mrf.mxu2  ;;  %v1593_v44 = vpop.f32.mrf.mxu1 }
 0x2d4   : > { %v2387_v54 = vmax.f32 %v2351_v30, 0.0  ;;  %v1800_v35 = vadd.f32 %v1744_v11, %v1646_v39  ;;  %v1647_v9 = vadd.f32 %v1593_v44, %v4730_v55  ;;  %v4733_v30 = vld [vmem:[#allocation52_spill] sm:$0xff]  ;;  %v2606_v44 = vpop.permute.xlu2 %2605 }
 0x2d6   : > { %2423 = vst [vmem:[%s4179_s7 + $0xb0] sm:$0xff] %v2387_v54  ;;  %v2675_v51 = vmul.f32 %v2586_v8, %v2387_v54  ;;  %v2080_v47 = vadd.f32 %v2024_v42, %v1800_v35  ;;  %v2259_v21 = vpop.f32.mrf.mxu0 }
 0x2d8   : > { %v2710_v37 = vadd.f32 %v2709_v59, %v2675_v51  ;;  %v2312_v5 = vadd.f32 %v2256_v53, %v2080_v47  ;;  %v2034_v25 = vpop.f32.mrf.mxu3 }
 0x2da   : > { %v2352_v62 = vadd.f32 %v4164_v1, %v2312_v5 }
 0x2db   : > { %v1747_v28 = vpop.f32.mrf.mxu2  ;;  %v1595_v15 = vpop.f32.mrf.mxu1 }
 0x2dc   : > { %v2388_v27 = vmax.f32 %v2352_v62, 0.0  ;;  %v1801_v17 = vadd.f32 %v1747_v28, %v1647_v9  ;;  %v1648_v38 = vadd.f32 %v1595_v15, %v4731_v10 }
 0x2de   : > { %2424 = vst [vmem:[%s4179_s7 + $0xb8] sm:$0xff] %v2388_v27  ;;  %v2676_v12 = vmul.f32 %v2591_v4, %v2388_v27  ;;  %v2081_v23 = vadd.f32 %v2027_v6, %v1801_v17  ;;  %v2261_v24 = vpop.f32.mrf.mxu0  ;;  %v2611_v17 = vpop.permute.xlu0 %2610 }
 0x2e0   : > { %v2711_v14 = vadd.f32 %v2710_v37, %v2676_v12  ;;  %v2313_v42 = vadd.f32 %v2259_v21, %v2081_v23  ;;  %v2037_v53 = vpop.f32.mrf.mxu3 }
 0x2e2   : > { %v2353_v13 = vadd.f32 %v4164_v1, %v2313_v42  ;;  %v4734_v42 = vld [vmem:[#allocation11_spill] sm:$0xff] }
 0x2e3   : > { %v1749_v34 = vpop.f32.mrf.mxu2  ;;  %v1598_v61 = vpop.f32.mrf.mxu1 }
 0x2e4   : > { %v2389_v31 = vmax.f32 %v2353_v13, 0.0  ;;  %v1802_v41 = vadd.f32 %v1749_v34, %v1648_v38  ;;  %v1649_v19 = vadd.f32 %v1598_v61, %v4732_v0 }
 0x2e6   : > { %2425 = vst [vmem:[%s4179_s7 + $0xc0] sm:$0xff] %v2389_v31  ;;  %v2677_v36 = vmul.f32 %v2596_v60, %v2389_v31  ;;  %v2082_v2 = vadd.f32 %v2029_v46, %v1802_v41  ;;  %v2264_v20 = vpop.f32.mrf.mxu0  ;;  %v4478_v46 = vld [vmem:[%s4560_s2] ss:$0 sm:$0xff]  ;;  %v2616_v41 = vpop.permute.xlu1 %2615 }
 0x2e8   : > { %v2712_v48 = vadd.f32 %v2711_v14, %v2677_v36  ;;  %v2314_v6 = vadd.f32 %v2261_v24, %v2082_v2  ;;  %v2039_v5 = vpop.f32.mrf.mxu3 }
 0x2ea   : > { %v2354_v50 = vadd.f32 %v4164_v1, %v2314_v6 }
 0x2eb   : > { %v1752_v45 = vpop.f32.mrf.mxu2  ;;  %v1600_v3 = vpop.f32.mrf.mxu1 }
 0x2ec   : > { %v2390_v43 = vmax.f32 %v2354_v50, 0.0  ;;  %v1803_v49 = vadd.f32 %v1752_v45, %v1649_v19  ;;  %v1650_v56 = vadd.f32 %v1600_v3, %v4733_v30  ;;  %v2621_v45 = vpop.permute.xlu2 %2620  ;;  %v2626_v30 = vpop.permute.xlu0 %2625 }
 0x2ee   : > { %2426 = vst [vmem:[%s4179_s7 + $0xc8] sm:$0xff] %v2390_v43  ;;  %v2678_v63 = vmul.f32 %v2601_v52, %v2390_v43  ;;  %v2083_v18 = vadd.f32 %v2032_v16, %v1803_v49  ;;  %v2266_v40 = vpop.f32.mrf.mxu0 }
 0x2f0   : > { %v2713_v59 = vadd.f32 %v2712_v48, %v2678_v63  ;;  %v2315_v57 = vadd.f32 %v2264_v20, %v2083_v18  ;;  %v2042_v38 = vpop.f32.mrf.mxu3 }
 0x2f2   : > { %v2355_v1 = vadd.f32 %v4478_v46, %v2315_v57 }
 0x2f3   : > { %v1754_v39 = vpop.f32.mrf.mxu2  ;;  %v1603_v35 = vpop.f32.mrf.mxu1 }
 0x2f4   : > { %v2391_v11 = vmax.f32 %v2355_v1, 0.0  ;;  %v1804_v54 = vadd.f32 %v1754_v39, %v1650_v56  ;;  %v1651_v55 = vadd.f32 %v1603_v35, %v4066_v32 }
 0x2f6   : > { %2427 = vst [vmem:[%s4179_s7 + $0xd0] sm:$0xff] %v2391_v11  ;;  %v2679_v8 = vmul.f32 %v2606_v44, %v2391_v11  ;;  %v2084_v51 = vadd.f32 %v2034_v25, %v1804_v54  ;;  %v2269_v47 = vpop.f32.mrf.mxu0 }
 0x2f8   : > { %v2714_v21 = vadd.f32 %v2713_v59, %v2679_v8  ;;  %v2316_v37 = vadd.f32 %v2266_v40, %v2084_v51  ;;  %v2044_v43 = vpop.f32.mrf.mxu3 }
 0x2fa   : > { %v2356_v62 = vadd.f32 %v4478_v46, %v2316_v37 }
 0x2fb   : > { %v1757_v9 = vpop.f32.mrf.mxu2  ;;  %v1605_v27 = vpop.f32.mrf.mxu1 }
 0x2fc   : > { %v2392_v28 = vmax.f32 %v2356_v62, 0.0  ;;  %v1805_v16 = vadd.f32 %v1757_v9, %v1651_v55  ;;  %v1652_v13 = vadd.f32 %v1605_v27, %v4734_v42 }
 0x2fe   : > { %2428 = vst [vmem:[%s4179_s7 + $0xd8] sm:$0xff] %v2392_v28  ;;  %v2680_v15 = vmul.f32 %v2611_v17, %v2392_v28  ;;  %v2085_v4 = vadd.f32 %v2037_v53, %v1805_v16  ;;  %v2271_v12 = vpop.f32.mrf.mxu0 }
 0x300   : > { %v2715_v23 = vadd.f32 %v2714_v21, %v2680_v15  ;;  %v2317_v24 = vadd.f32 %v2269_v47, %v2085_v4  ;;  %v2047_v11 = vpop.f32.mrf.mxu3 }
 0x302   : > { %v2357_v14 = vadd.f32 %v4478_v46, %v2317_v24 }
 0x303   : > { %v1759_v10 = vpop.f32.mrf.mxu2  ;;  %v1608_v31 = vpop.f32.mrf.mxu1 }
 0x304   : > { %v2393_v34 = vmax.f32 %v2357_v14, 0.0  ;;  %v1806_v32 = vadd.f32 %v1759_v10, %v1652_v13  ;;  %v1653_v48 = vadd.f32 %v1608_v31, %v4089_v7 }
 0x306   : > { %2429 = vst [vmem:[%s4179_s7 + $0xe0] sm:$0xff] %v2393_v34  ;;  %v2681_v61 = vmul.f32 %v2616_v41, %v2393_v34  ;;  %v2086_v60 = vadd.f32 %v2039_v5, %v1806_v32  ;;  %v2274_v25 = vpop.f32.mrf.mxu0  ;;  %v2631_v5 = vpop.permute.xlu1 %2630 }
 0x308   : > { %v2716_v36 = vadd.f32 %v2715_v23, %v2681_v61  ;;  %v2318_v2 = vadd.f32 %v2271_v12, %v2086_v60  ;;  %v2049_v16 = vpop.f32.mrf.mxu3  ;;  %v2636_v23 = vpop.permute.xlu2 %2635 }
 0x309   : > { %v2641_v61 = vpop.permute.xlu0 %2640 }
 0x30a   : > { %v2358_v20 = vadd.f32 %v4478_v46, %v2318_v2 }
 0x30b   : > { %v1762_v6 = vpop.f32.mrf.mxu2  ;;  %v1610_v19 = vpop.f32.mrf.mxu1 }
 0x30c   : > { %v2394_v50 = vmax.f32 %v2358_v20, 0.0  ;;  %v1807_v0 = vadd.f32 %v1762_v6, %v1653_v48  ;;  %v1654_v53 = vadd.f32 %v1610_v19, %v4101_v58 }
 0x30e   : > { %2430 = vst [vmem:[%s4179_s7 + $0xe8] sm:$0xff] %v2394_v50  ;;  %v2682_v49 = vmul.f32 %v2621_v45, %v2394_v50  ;;  %v2087_v3 = vadd.f32 %v2042_v38, %v1807_v0  ;;  %v2276_v52 = vpop.f32.mrf.mxu0  ;;  %v2646_v45 = vpop.permute.xlu1 %2645 }
 0x310   : > { %v2717_v63 = vadd.f32 %v2716_v36, %v2682_v49  ;;  %v2319_v18 = vadd.f32 %v2274_v25, %v2087_v3  ;;  %v2052_v32 = vpop.f32.mrf.mxu3 }
 0x312   : > { %v2359_v40 = vadd.f32 %v4478_v46, %v2319_v18 }
 0x313   : > { %v1764_v59 = vpop.f32.mrf.mxu2  ;;  %v1613_v1 = vpop.f32.mrf.mxu1 }
 0x314   : > { %v2395_v57 = vmax.f32 %v2359_v40, 0.0  ;;  %v1808_v7 = vadd.f32 %v1764_v59, %v1654_v53  ;;  %v1655_v51 = vadd.f32 %v1613_v1, %v4112_v29  ;;  %v2651_v53 = vpop.permute.xlu2 %2650 }
 0x316   : > { %2431 = vst [vmem:[%s4179_s7 + $0xf0] sm:$0xff] %v2395_v57  ;;  %v2683_v56 = vmul.f32 %v2626_v30, %v2395_v57  ;;  %v2088_v39 = vadd.f32 %v2044_v43, %v1808_v7  ;;  %v2279_v44 = vpop.f32.mrf.mxu0 }
 0x318   : > { %v2718_v54 = vadd.f32 %v2717_v63, %v2683_v56  ;;  %v2320_v35 = vadd.f32 %v2276_v52, %v2088_v39  ;;  %v2054_v43 = vpop.f32.mrf.mxu3 }
 0x31a   : > { %v2360_v8 = vadd.f32 %v4478_v46, %v2320_v35 }
 0x31b   : > { %v1767_v47 = vpop.f32.mrf.mxu2  ;;  %v1615_v37 = vpop.f32.mrf.mxu1 }
 0x31c   : > { %v2396_v21 = vmax.f32 %v2360_v8, 0.0  ;;  %v1809_v58 = vadd.f32 %v1767_v47, %v1655_v51  ;;  %v1656_v17 = vadd.f32 %v1615_v37, %v4124_v26 }
 0x31e   : > { %2432 = vst [vmem:[%s4179_s7 + $0xf8] sm:$0xff] %v2396_v21  ;;  %v2684_v62 = vmul.f32 %v2631_v5, %v2396_v21  ;;  %v2089_v55 = vadd.f32 %v2047_v11, %v1809_v58  ;;  %v2281_v15 = vpop.f32.mrf.mxu0 }
 0x320   : > { %v2719_v9 = vadd.f32 %v2718_v54, %v2684_v62  ;;  %v2321_v28 = vadd.f32 %v2279_v44, %v2089_v55 }
 0x322   : > { %v2361_v27 = vadd.f32 %v4478_v46, %v2321_v28 }
 0x323   : > { %v1769_v4 = vpop.f32.mrf.mxu2  ;;  %v1618_v24 = vpop.f32.mrf.mxu1 }
 0x324   : > { %v2397_v12 = vmax.f32 %v2361_v27, 0.0  ;;  %v1810_v29 = vadd.f32 %v1769_v4, %v1656_v17  ;;  %v1657_v34 = vadd.f32 %v1618_v24, %v4135_v33 }
 0x326   : > { %2433 = vst [vmem:[%s4179_s7 + $0x100] sm:$0xff] %v2397_v12  ;;  %v2685_v14 = vmul.f32 %v2636_v23, %v2397_v12  ;;  %v2090_v42 = vadd.f32 %v2049_v16, %v1810_v29  ;;  %v2284_v60 = vpop.f32.mrf.mxu0 }
 0x328   : > { %v2720_v13 = vadd.f32 %v2719_v9, %v2685_v14  ;;  %v2322_v10 = vadd.f32 %v2281_v15, %v2090_v42 }
 0x32a   : > { %v2362_v38 = vadd.f32 %v4478_v46, %v2322_v10 }
 0x32b   : > { %v1772_v31 = vpop.f32.mrf.mxu2  ;;  %v1620_v2 = vpop.f32.mrf.mxu1 }
 0x32c   : > { %v2398_v26 = vmax.f32 %v2362_v38, 0.0  ;;  %v1811_v41 = vadd.f32 %v1772_v31, %v1657_v34  ;;  %v1658_v50 = vadd.f32 %v1620_v2, %v4149_v22 }
 0x32e   : > { %2434 = vst [vmem:[%s4179_s7 + $0x108] sm:$0xff] %v2398_v26  ;;  %v2686_v25 = vmul.f32 %v2641_v61, %v2398_v26  ;;  %v2091_v36 = vadd.f32 %v2052_v32, %v1811_v41  ;;  %v2286_v52 = vpop.f32.mrf.mxu0 }
 0x330   : > { %v2721_v20 = vadd.f32 %v2720_v13, %v2686_v25  ;;  %v2323_v48 = vadd.f32 %v2284_v60, %v2091_v36 }
 0x332   : > { %v2363_v6 = vadd.f32 %v4478_v46, %v2323_v48 }
 0x333   : > { %v1774_v33 = vpop.f32.mrf.mxu2 }
 0x334   : > { %v2399_v0 = vmax.f32 %v2363_v6, 0.0  ;;  %v1812_v19 = vadd.f32 %v1774_v33, %v1658_v50 }
 0x336   : > { %2435 = vst [vmem:[%s4179_s7 + $0x110] sm:$0xff] %v2399_v0  ;;  %v2687_v49 = vmul.f32 %v2646_v45, %v2399_v0  ;;  %v2092_v3 = vadd.f32 %v2054_v43, %v1812_v19 }
 0x338   : > { %v2722_v63 = vadd.f32 %v2721_v20, %v2687_v49  ;;  %v2324_v18 = vadd.f32 %v2286_v52, %v2092_v3 }
 0x33a   : > { %v2364_v22 = vadd.f32 %v4478_v46, %v2324_v18 }
 0x33c   : > { %v2400_v40 = vmax.f32 %v2364_v22, 0.0 }
 0x33e   : > { %2436 = vst [vmem:[%s4179_s7 + $0x118] sm:$0xff] %v2400_v40  ;;  %v2688_v59 = vmul.f32 %v2651_v53, %v2400_v40 }
 0x33f   : > { %3118 = shalt.err (!%p3115_p3)
}
 0x340   : > { %s3188_s7 = smov 128   ;;  %s3189_s30 = smov 8   ;;  %v2723_v46 = vadd.f32 %v2722_v63, %v2688_v59 }
 0x341   : > { %3038 = dma.vmem_to_hbm [thread:$0]  (%p3258_p5), %s2749_s10, 4608, %s2751_s11, %s2732_s12, %s3188_s7, %s3188_s7, %s3189_s30  }
 0x342   : > { %v2724_v57 = vrot.slane %v2723_v46, 4  ;;  %s2762_s9 = scalar_lea.hbm %s4563_s5, %s3241_s22  ;;  %s227_s13 = scalar_lea.vmem [#allocation4], %s4157_s16 }
 0x343   : > { %s2764_s14 = sshll.u32 %s227_s13, 4  ;;  %s2766_s15 = sshll.u32 %s2762_s9, 4  ;;  %s2765_s14 = int_to_ptr.vmem [resolvable:$true] %s2764_s14  ;;  %s2767_s15 = int_to_ptr.hbm [resolvable:$true] %s2766_s15 }
 0x344   : > { %v2725_v7 = vadd.f32 %v2724_v57, %v2723_v46  ;;  %s2737_s23 = scalar_lea.sflag [#allocation5], %s4157_s16  ;;  %s3133_s10 = sshra.s32 %s2767_s15, 4  ;;  %s3134_s10 = int_to_ptr.hbm [resolvable:$true] %s3133_s10 }
 0x345   : > { %s3135_s11 = scalar_lea.hbm %s3134_s10, 1  ;;  %s3139_s22 = scalar_lea.hbm %s4563_s5, 4 }
 0x346   : > { %v2726_v1 = vrot.slane %v2725_v7, 2  ;;  %p3136_p4 = scmp.ne.s32.totalorder %s3134_s10, %s3135_s11  ;;  %p3140_p9 = scmp.lt.s32.totalorder %s3134_s10, %s4563_s5 }
 0x347   : > { %p3141_p10 = scmp.lt.s32.totalorder %s3139_s22, %s3135_s11 }
 0x348   : > { %v2727_v30 = vadd.f32 %v2726_v1, %v2725_v7  ;;  %p3137_p7 = pnand %p3136_p4, %p3258_p5 }
 0x349   : > { %p3142_p11 = por %p3141_p10, %p3140_p9 }
 0x34a   : > { %v2728_v56 = vrot.slane %v2727_v30, 1  ;;  %p3138_p8 = pneg %p3137_p7 }
 0x34c   : > { %v2729_v39 = vadd.f32 %v2728_v56, %v2727_v30  ;;  %p3143_p12 = pnand %p3142_p11, %p3138_p8 }
 0x34e   : > { %2730 = vst [vmem:[%s227_s13] sm:$0x1] %v2729_v39 }
 0x34f   : > { %3146 = shalt.err (!%p3143_p12)
}
 0x350   : > { %3039 = dma.vmem_to_hbm [thread:$0]  (%p3258_p5), %s2765_s14, 16, %s2767_s15, %s2737_s23  }
 0x351 PF: > { %p3049_p13 = scmp.ge.s32.totalorder %s3185_s21, 2  ;;  %s2778_s16 = sand.u32 1, %s3173_s18  }
 0x352   : > { %s2779_s7 = scalar_lea.sflag [#allocation3], %s2778_s16 }
 0x353   : > { %p3043_p0 = pnand %p3049_p13, %p3262_p6 }
 0x355   : > { %p3044_p1 = pneg %p3043_p0 }
 0x357   : > { %3164 = dma.done.wait (%p3044_p1), %s2779_s7, 4608  }
 0x358   : > { %3166 = vsyncadd (%p3044_p1), %s2779_s7, 4294962688  ;;  %s2789_s30 = scalar_lea.sflag [#allocation5], %s2778_s16 }
 0x359   : > { %3168 = dma.done.wait (%p3044_p1), %s2789_s30, 16  }
 0x35a   : > { %3170 = vsyncadd (%p3044_p1), %s2789_s30, 4294967280  ;;  %p19_p5 = scmp.ge.s32.totalorder %s3245_s24, 6   ;;  %s4735_s18 = smov %s3177_s19 }
 0x35b   : > { %s4736_s19 = smov %s3181_s20  ;;  %s4737_s20 = smov %s3256_s27 }
 0x35c   : > { %s4738_s21 = smov %s3245_s24  ;;  %21 = sbr.rel (!%p19_p5) target bundleno = 5 (0x5), region = 96 }
 0x361   :  { %2794 = vsyncpa [#allocation3], 1 }
 0x362   :  { %2796 = vsyncpa [#allocation3 + $0x1], 1 }
 0x363   :  { %2797 = vsyncpa [#allocation5], 1 }
 0x364   :  { %2799 = vsyncpa [#allocation5 + $0x1], 1 }

</bundles_post_ra>
